<compile_context>
chip_gen: v7x
topology: tpu7x:2x2x1
jax: 0.10.0
libtpu: 0.0.40
codegen_flags: <defaults>
</compile_context>

<pallas_src>
import functools

import jax
import jax.numpy as jnp
from jax.experimental import pallas as pl
from jax.experimental.pallas import tpu as pltpu


def _round_up(x, m):
    return (x + m - 1) // m * m


def _sublane_min(dtype):
    # Packed-dtype sublane minimum: 8 for f32, 16 for bf16, 32 for int8/fp8.
    return max(8, 32 // jnp.dtype(dtype).itemsize)


def _vmem_budget_bytes():
    """Generation-aware VMEM budget: 75% of physical capacity (headroom for
    Mosaic internal scratch); conservative 64 MiB fallback (v7x per-TC)."""
    try:
        cap = int(pltpu.get_tpu_info().vmem_capacity_bytes)
    except Exception:
        cap = 64 * 1024 * 1024
    return int(cap * 3 // 4)


# --------------------------------------------------------------------------
# Kernels
# --------------------------------------------------------------------------
def _fused_mlp_kernel(x_ref, *refs, num_layers, compute_dtype):
    """Fused (Linear -> ReLU) x num_layers on one batch tile.

    refs = (w0, b0, w1, b1, ..., o_ref)
      x_ref : (tm, Din_pad)            compute_dtype
      w_i   : (Din_i_pad, Dout_i_pad)  compute_dtype  (pre-transposed)
      b_i   : (1, Dout_i_pad)          float32
      o_ref : (tm, Dout_last_pad)      float32
    """
    o_ref = refs[-1]
    h = x_ref[...]
    for i in range(num_layers):
        w = refs[2 * i][...]
        b = refs[2 * i + 1][...]
        y = jnp.dot(h, w, preferred_element_type=jnp.float32)   # MXU, f32 acc
        y = jnp.maximum(y + b, 0.0)                              # bias+ReLU f32
        # feed the next MXU pass in the compute dtype; keep last layer in f32
        h = y.astype(compute_dtype) if i < num_layers - 1 else y
    o_ref[...] = h.astype(o_ref.dtype)


def _linear_relu_kernel(x_ref, w_ref, b_ref, o_ref, acc_ref):
    """Streamed Linear + bias + ReLU with a K-reduction grid axis (axis 2)."""
    k = pl.program_id(2)

    @pl.when(k == 0)
    def _():
        acc_ref[...] = jnp.zeros_like(acc_ref)

    acc_ref[...] += jnp.dot(x_ref[...], w_ref[...],
                            preferred_element_type=jnp.float32)

    @pl.when(k == pl.num_programs(2) - 1)
    def _():
        o_ref[...] = jnp.maximum(acc_ref[...] + b_ref[...], 0.0).astype(o_ref.dtype)


# --------------------------------------------------------------------------
# Parameter prep
# --------------------------------------------------------------------------
def init_mlp_params(key, sizes, binary_flags=None):
    """nn.Linear default init (U[-1/sqrt(fan_in), 1/sqrt(fan_in)]).
    BinaryLinear layers take the sign of the initialised values.
    Returned in PyTorch layout: weight (out, in), bias (out,)."""
    if binary_flags is None:
        binary_flags = [False] * (len(sizes) - 1)
    params = []
    for i in range(len(sizes) - 1):
        fan_in, fan_out = sizes[i], sizes[i + 1]
        key, kw, kb = jax.random.split(key, 3)
        bound = 1.0 / jnp.sqrt(float(fan_in))
        w = jax.random.uniform(kw, (fan_out, fan_in), jnp.float32, -bound, bound)
        b = jax.random.uniform(kb, (fan_out,), jnp.float32, -bound, bound)
        if binary_flags[i]:
            w = jnp.sign(w)
            b = jnp.sign(b)
        params.append((w, b))
    return params


def prepare_params(params, compute_dtype=jnp.bfloat16):
    """One-time prep: transpose to (Din, Dout), zero-pad both dims to multiples
    of 128 (lane/sublane dense), cast weights to compute_dtype, keep biases f32.
    Zero padding is exact: padded activation columns stay 0 through ReLU."""
    cdt = jnp.dtype(compute_dtype)
    prepared = []
    for (w, b) in params:
        dout, din = w.shape
        din_p, dout_p = _round_up(din, 128), _round_up(dout, 128)
        w_t = jnp.zeros((din_p, dout_p), cdt)
        w_t = w_t.at[:din, :dout].set(jnp.transpose(w).astype(cdt))
        b_p = jnp.zeros((1, dout_p), jnp.float32)
        b_p = b_p.at[0, :dout].set(b.astype(jnp.float32))
        prepared.append((w_t, b_p, dout))
    return prepared


# --------------------------------------------------------------------------
# Streaming (K-reduction) per-layer call
# --------------------------------------------------------------------------
def _streamed_linear_relu(x_p, w_t, b_pd, out_dtype, *, tm, vmem_limit):
    m_p, din_p = x_p.shape
    _, dout_p = w_t.shape
    # 256-wide N tile is MXU-native on v6e/v7x; 128 also fully feeds v5e's MXU.
    tn = 256 if dout_p % 256 == 0 else 128
    tk = 512
    while din_p % tk != 0:
        tk //= 2
    grid = (m_p // tm, dout_p // tn, din_p // tk)

    flops = 2 * m_p * din_p * dout_p
    bytes_accessed = (m_p * din_p * x_p.dtype.itemsize * (dout_p // tn)
                      + din_p * dout_p * w_t.dtype.itemsize * (m_p // tm)
                      + dout_p * 4
                      + m_p * dout_p * jnp.dtype(out_dtype).itemsize)

    return pl.pallas_call(
        _linear_relu_kernel,
        out_shape=jax.ShapeDtypeStruct((m_p, dout_p), out_dtype),
        grid=grid,
        in_specs=[pl.BlockSpec((tm, tk), lambda i, j, k: (i, k)),
                  pl.BlockSpec((tk, tn), lambda i, j, k: (k, j)),
                  pl.BlockSpec((1, tn), lambda i, j, k: (0, j))],
        out_specs=pl.BlockSpec((tm, tn), lambda i, j, k: (i, j)),
        scratch_shapes=[pltpu.VMEM((tm, tn), jnp.float32)],
        compiler_params=pltpu.CompilerParams(
            dimension_semantics=("parallel", "parallel", "arbitrary"),
            vmem_limit_bytes=vmem_limit),
        cost_estimate=pl.CostEstimate(flops=flops, transcendentals=0,
                                      bytes_accessed=bytes_accessed),
    )(x_p, w_t, b_pd)


# --------------------------------------------------------------------------
# Forward wrapper
# --------------------------------------------------------------------------
def mlp_forward(x, prepared, *, force_stream=False):
    """x: (B, C, H, W) NCHW.  Flatten + stack of (Linear -> ReLU) layers, with
    ReLU applied after every layer (reproducing the PyTorch module)."""
    B = x.shape[0]
    h = x.reshape(B, -1)                     # nn.Flatten()
    din = h.shape[1]

    cdt = jnp.dtype(prepared[0][0].dtype)    # compute dtype from prepared weights
    din_p = prepared[0][0].shape[0]
    dlast = prepared[-1][2]
    dlast_p = prepared[-1][0].shape[1]
    assert din <= din_p

    sub = _sublane_min(cdt)
    b_p = _round_up(B, sub)
    budget = _vmem_budget_bytes()

    weight_bytes = sum(w.size * w.dtype.itemsize + bb.size * bb.dtype.itemsize
                       for (w, bb, _) in prepared)
    max_dp = max(max(w.shape[0], w.shape[1]) for (w, _, _) in prepared)

    def fused_resident(tm_):
        # single-buffered weights + double-buffered x/out tiles + in-kernel
        # intermediates (live h plus per-layer f32 y), generous.
        return (weight_bytes
                + 2 * tm_ * din_p * cdt.itemsize
                + 2 * tm_ * dlast_p * 4
                + 3 * tm_ * max_dp * 4)

    # --- batch tile selection: up to 512 rows, shrink until it fits VMEM ---
    tm = min(b_p, 512)
    while tm > sub and fused_resident(tm) > budget:
        tm = max(sub, _round_up(tm // 2, sub))
    use_fused = (not force_stream) and (fused_resident(tm) <= budget)
    if not use_fused:
        tm = min(b_p, 512)                   # streaming tiles are small anyway

    # >=2 grid steps when the batch allows, so 'parallel' can use both v7x TCs.
    if (_round_up(b_p, tm) // tm) < 2 and b_p >= 2 * sub:
        tm = _round_up((b_p + 1) // 2, sub)
    b_p = _round_up(b_p, tm)

    # --- input: cast/pad only when actually needed (no gratuitous HBM copy) ---
    if h.dtype != cdt:
        h = h.astype(cdt)
    if (B != b_p) or (din != din_p):
        h = jnp.pad(h, ((0, b_p - B), (0, din_p - din)))
    x_p = h

    if use_fused:
        num_layers = len(prepared)
        kernel = functools.partial(_fused_mlp_kernel, num_layers=num_layers,
                                   compute_dtype=cdt)
        wb_args = []
        for (w_t, b_pd, _) in prepared:
            wb_args += [w_t, b_pd]

        flops = sum(2 * b_p * w.shape[0] * w.shape[1] for (w, _, _) in prepared)
        bytes_accessed = (weight_bytes + b_p * din_p * cdt.itemsize
                          + b_p * dlast_p * 4)

        def build_in_specs(single_buffer_weights):
            specs = [pl.BlockSpec((tm, din_p), lambda i: (i, 0))]
            for (w_t, b_pd, _) in prepared:
                if single_buffer_weights:
                    # constant block index -> DMA once, single-buffered.
                    specs.append(pl.BlockSpec(w_t.shape, lambda i: (0, 0),
                                              pipeline_mode=pl.Buffered(1)))
                    specs.append(pl.BlockSpec(b_pd.shape, lambda i: (0, 0),
                                              pipeline_mode=pl.Buffered(1)))
                else:
                    specs.append(pl.BlockSpec(w_t.shape, lambda i: (0, 0)))
                    specs.append(pl.BlockSpec(b_pd.shape, lambda i: (0, 0)))
            return specs

        def run(in_specs):
            return pl.pallas_call(
                kernel,
                out_shape=jax.ShapeDtypeStruct((b_p, dlast_p), jnp.float32),
                grid=(b_p // tm,),
                in_specs=in_specs,
                out_specs=pl.BlockSpec((tm, dlast_p), lambda i: (i, 0)),
                compiler_params=pltpu.CompilerParams(
                    dimension_semantics=("parallel",),
                    vmem_limit_bytes=budget),
                cost_estimate=pl.CostEstimate(flops=flops, transcendentals=0,
                                              bytes_accessed=bytes_accessed),
            )(x_p, *wb_args)

        try:
            out = run(build_in_specs(True))
        except Exception:
            # pl.Buffered(1) unsupported on this jax build: default buffering.
            out = run(build_in_specs(False))
    else:
        # Streaming path: per-layer tiled matmul, K-reduction grid axis last.
        h_cur = x_p
        for li, (w_t, b_pd, _) in enumerate(prepared):
            last = (li == len(prepared) - 1)
            out_dtype = jnp.float32 if last else cdt
            h_cur = _streamed_linear_relu(h_cur, w_t, b_pd, out_dtype,
                                          tm=tm, vmem_limit=budget)
        out = h_cur

    return out[:B, :dlast]


# --------------------------------------------------------------------------
if __name__ == "__main__":
    key = jax.random.PRNGKey(0)
    k_x, k_p = jax.random.split(key)

    # Small shapes: batch=2, channels=4, spatial=16x16 -> flattened 1024.
    B, C, H, W = 2, 4, 16, 16
    x = jax.random.normal(k_x, (B, C, H, W), jnp.float32)

    # MLP(sizes=[1024, 32, 10], activations=['ReLU', 'ReLU'])
    sizes = [C * H * W, 32, 10]
    params = init_mlp_params(k_p, sizes, binary_flags=None)

    # Pure-JAX reference (ReLU after every layer, incl. the last -- see note).
    ref = x.reshape(B, -1)
    for (w, b) in params:
        ref = jnp.maximum(ref @ w.T + b, 0.0)

    # ---- f32 fused path: tight check ----
    prep_f32 = prepare_params(params, jnp.float32)
    out_f32 = mlp_forward(x, prep_f32)
    jax.block_until_ready(out_f32)
    assert out_f32.shape == (B, sizes[-1])
    assert jnp.allclose(out_f32, ref, atol=1e-5, rtol=1e-5)

    # ---- f32 streaming (K-reduction) path, forced, same tight check ----
    out_stream = mlp_forward(x, prep_f32, force_stream=True)
    jax.block_until_ready(out_stream)
    assert out_stream.shape == (B, sizes[-1])
    assert jnp.allclose(out_stream, ref, atol=1e-5, rtol=1e-5)

    # ---- bf16 weights/activations (f32 MXU accumulation) path ----
    prep_bf16 = prepare_params(params, jnp.bfloat16)
    out_bf16 = mlp_forward(x, prep_bf16)
    jax.block_until_ready(out_bf16)
    h_ref = x.reshape(B, -1).astype(jnp.bfloat16)
    for li, (w, b) in enumerate(params):
        y = jnp.dot(h_ref, jnp.transpose(w).astype(jnp.bfloat16),
                    preferred_element_type=jnp.float32) + b
        y = jnp.maximum(y, 0.0)
        h_ref = y.astype(jnp.bfloat16) if li < len(params) - 1 else y
    assert out_bf16.shape == (B, sizes[-1])
    assert jnp.allclose(out_bf16, h_ref, atol=1e-2, rtol=1e-2)

    print("KERNEL_OK")
</pallas_src>

<mosaic_0001>
module attributes {stable_mosaic.version = 11 : i64} {
  func.func @_fused_mlp_kernel(%arg0: i32, %arg1: memref<8x1024xf32, #tpu.memory_space<vmem>>, %arg2: memref<1024x128xf32, #tpu.memory_space<vmem>>, %arg3: memref<1x128xf32, #tpu.memory_space<vmem>>, %arg4: memref<128x128xf32, #tpu.memory_space<vmem>>, %arg5: memref<1x128xf32, #tpu.memory_space<vmem>>, %arg6: memref<8x128xf32, #tpu.memory_space<vmem>>) attributes {dimension_semantics = [#tpu.dimension_semantics<parallel>], iteration_bounds = array<i64: 1>, scalar_prefetch = 0 : i64, scratch_operands = 0 : i64, tpu.core_type = #tpu.core_type<tc>, window_params = [{transform_indices = @transform_0, window_bounds = array<i64: 8, 1024>}, {pipeline_mode = #tpu.pipeline_mode<synchronous>, transform_indices = @transform_1, window_bounds = array<i64: 1024, 128>}, {pipeline_mode = #tpu.pipeline_mode<synchronous>, transform_indices = @transform_2, window_bounds = array<i64: 1, 128>}, {pipeline_mode = #tpu.pipeline_mode<synchronous>, transform_indices = @transform_3, window_bounds = array<i64: 128, 128>}, {pipeline_mode = #tpu.pipeline_mode<synchronous>, transform_indices = @transform_4, window_bounds = array<i64: 1, 128>}, {transform_indices = @transform_5, window_bounds = array<i64: 8, 128>}]} {
    %c0 = arith.constant 0 : index
    %c0_0 = arith.constant 0 : index
    %0 = vector.load %arg1[%c0, %c0_0] : memref<8x1024xf32, #tpu.memory_space<vmem>>, vector<8x1024xf32>
    %c0_1 = arith.constant 0 : index
    %c0_2 = arith.constant 0 : index
    %1 = vector.load %arg2[%c0_1, %c0_2] : memref<1024x128xf32, #tpu.memory_space<vmem>>, vector<1024x128xf32>
    %c0_3 = arith.constant 0 : index
    %c0_4 = arith.constant 0 : index
    %2 = vector.load %arg3[%c0_3, %c0_4] : memref<1x128xf32, #tpu.memory_space<vmem>>, vector<1x128xf32>
    %cst = arith.constant dense<0.000000e+00> : vector<8x128xf32>
    %3 = tpu.matmul %0, %1, %cst {dimension_numbers = #tpu.dot_dimension_numbers<[1], [0], [0], [1], [0, 0, 1, 1], [], []>} : vector<8x1024xf32>, vector<1024x128xf32>, vector<8x128xf32> -> vector<8x128xf32>
    %4 = vector.broadcast %2 : vector<1x128xf32> to vector<8x128xf32>
    %5 = arith.addf %3, %4 : vector<8x128xf32>
    %cst_5 = arith.constant 0.000000e+00 : f32
    %6 = vector.broadcast %cst_5 : f32 to vector<8x128xf32>
    %7 = arith.maximumf %5, %6 : vector<8x128xf32>
    %c0_6 = arith.constant 0 : index
    %c0_7 = arith.constant 0 : index
    %8 = vector.load %arg4[%c0_6, %c0_7] : memref<128x128xf32, #tpu.memory_space<vmem>>, vector<128x128xf32>
    %c0_8 = arith.constant 0 : index
    %c0_9 = arith.constant 0 : index
    %9 = vector.load %arg5[%c0_8, %c0_9] : memref<1x128xf32, #tpu.memory_space<vmem>>, vector<1x128xf32>
    %cst_10 = arith.constant dense<0.000000e+00> : vector<8x128xf32>
    %10 = tpu.matmul %7, %8, %cst_10 {dimension_numbers = #tpu.dot_dimension_numbers<[1], [0], [0], [1], [0, 0, 1, 1], [], []>} : vector<8x128xf32>, vector<128x128xf32>, vector<8x128xf32> -> vector<8x128xf32>
    %11 = vector.broadcast %9 : vector<1x128xf32> to vector<8x128xf32>
    %12 = arith.addf %10, %11 : vector<8x128xf32>
    %cst_11 = arith.constant 0.000000e+00 : f32
    %13 = vector.broadcast %cst_11 : f32 to vector<8x128xf32>
    %14 = arith.maximumf %12, %13 : vector<8x128xf32>
    %c0_12 = arith.constant 0 : index
    %c0_13 = arith.constant 0 : index
    %15 = vector.load %arg6[%c0_12, %c0_13] : memref<8x128xf32, #tpu.memory_space<vmem>>, vector<8x128xf32>
    tpu.vector_store %arg6[%c0_12, %c0_13], %14 {strides = array<i32>} : memref<8x128xf32, #tpu.memory_space<vmem>>, vector<8x128xf32>,
    return
  }
  func.func @transform_0(%arg0: i32) -> (i32, i32) {
    %c0_i32 = arith.constant 0 : i32
    %c0_i32_0 = arith.constant 0 : i32
    return %arg0, %c0_i32 : i32, i32
  }
  func.func @transform_1(%arg0: i32) -> (i32, i32) {
    %c0_i32 = arith.constant 0 : i32
    %c0_i32_0 = arith.constant 0 : i32
    %c0_i32_1 = arith.constant 0 : i32
    return %c0_i32, %c0_i32_0 : i32, i32
  }
  func.func @transform_2(%arg0: i32) -> (i32, i32) {
    %c0_i32 = arith.constant 0 : i32
    %c0_i32_0 = arith.constant 0 : i32
    %c0_i32_1 = arith.constant 0 : i32
    return %c0_i32, %c0_i32_0 : i32, i32
  }
  func.func @transform_3(%arg0: i32) -> (i32, i32) {
    %c0_i32 = arith.constant 0 : i32
    %c0_i32_0 = arith.constant 0 : i32
    %c0_i32_1 = arith.constant 0 : i32
    return %c0_i32, %c0_i32_0 : i32, i32
  }
  func.func @transform_4(%arg0: i32) -> (i32, i32) {
    %c0_i32 = arith.constant 0 : i32
    %c0_i32_0 = arith.constant 0 : i32
    %c0_i32_1 = arith.constant 0 : i32
    return %c0_i32, %c0_i32_0 : i32, i32
  }
  func.func @transform_5(%arg0: i32) -> (i32, i32) {
    %c0_i32 = arith.constant 0 : i32
    %c0_i32_0 = arith.constant 0 : i32
    return %arg0, %c0_i32 : i32, i32
  }
}

module attributes {stable_mosaic.version = 11 : i64} {
  func.func @_fused_mlp_kernel(%arg0: i32, %arg1: memref<8x1024xf32, #tpu.memory_space<vmem>>, %arg2: memref<1024x128xf32, #tpu.memory_space<vmem>>, %arg3: memref<1x128xf32, #tpu.memory_space<vmem>>, %arg4: memref<128x128xf32, #tpu.memory_space<vmem>>, %arg5: memref<1x128xf32, #tpu.memory_space<vmem>>, %arg6: memref<8x128xf32, #tpu.memory_space<vmem>>) attributes {dimension_semantics = [#tpu.dimension_semantics<parallel>], iteration_bounds = array<i64: 1>, scalar_prefetch = 0 : i64, scratch_operands = 0 : i64, tpu.core_type = #tpu.core_type<tc>, window_params = [{transform_indices = @transform_0, window_bounds = array<i64: 8, 1024>}, {pipeline_mode = #tpu.pipeline_mode<synchronous>, transform_indices = @transform_1, window_bounds = array<i64: 1024, 128>}, {pipeline_mode = #tpu.pipeline_mode<synchronous>, transform_indices = @transform_2, window_bounds = array<i64: 1, 128>}, {pipeline_mode = #tpu.pipeline_mode<synchronous>, transform_indices = @transform_3, window_bounds = array<i64: 128, 128>}, {pipeline_mode = #tpu.pipeline_mode<synchronous>, transform_indices = @transform_4, window_bounds = array<i64: 1, 128>}, {transform_indices = @transform_5, window_bounds = array<i64: 8, 128>}]} {
    %c0 = arith.constant 0 : index
    %c0_0 = arith.constant 0 : index
    %0 = vector.load %arg1[%c0, %c0_0] : memref<8x1024xf32, #tpu.memory_space<vmem>>, vector<8x1024xf32>
    %c0_1 = arith.constant 0 : index
    %c0_2 = arith.constant 0 : index
    %1 = vector.load %arg2[%c0_1, %c0_2] : memref<1024x128xf32, #tpu.memory_space<vmem>>, vector<1024x128xf32>
    %c0_3 = arith.constant 0 : index
    %c0_4 = arith.constant 0 : index
    %2 = vector.load %arg3[%c0_3, %c0_4] : memref<1x128xf32, #tpu.memory_space<vmem>>, vector<1x128xf32>
    %cst = arith.constant dense<0.000000e+00> : vector<8x128xf32>
    %3 = tpu.matmul %0, %1, %cst {dimension_numbers = #tpu.dot_dimension_numbers<[1], [0], [0], [1], [0, 0, 1, 1], [], []>} : vector<8x1024xf32>, vector<1024x128xf32>, vector<8x128xf32> -> vector<8x128xf32>
    %4 = vector.broadcast %2 : vector<1x128xf32> to vector<8x128xf32>
    %5 = arith.addf %3, %4 : vector<8x128xf32>
    %cst_5 = arith.constant 0.000000e+00 : f32
    %6 = vector.broadcast %cst_5 : f32 to vector<8x128xf32>
    %7 = arith.maximumf %5, %6 : vector<8x128xf32>
    %c0_6 = arith.constant 0 : index
    %c0_7 = arith.constant 0 : index
    %8 = vector.load %arg4[%c0_6, %c0_7] : memref<128x128xf32, #tpu.memory_space<vmem>>, vector<128x128xf32>
    %c0_8 = arith.constant 0 : index
    %c0_9 = arith.constant 0 : index
    %9 = vector.load %arg5[%c0_8, %c0_9] : memref<1x128xf32, #tpu.memory_space<vmem>>, vector<1x128xf32>
    %cst_10 = arith.constant dense<0.000000e+00> : vector<8x128xf32>
    %10 = tpu.matmul %7, %8, %cst_10 {dimension_numbers = #tpu.dot_dimension_numbers<[1], [0], [0], [1], [0, 0, 1, 1], [], []>} : vector<8x128xf32>, vector<128x128xf32>, vector<8x128xf32> -> vector<8x128xf32>
    %11 = vector.broadcast %9 : vector<1x128xf32> to vector<8x128xf32>
    %12 = arith.addf %10, %11 : vector<8x128xf32>
    %cst_11 = arith.constant 0.000000e+00 : f32
    %13 = vector.broadcast %cst_11 : f32 to vector<8x128xf32>
    %14 = arith.maximumf %12, %13 : vector<8x128xf32>
    %c0_12 = arith.constant 0 : index
    %c0_13 = arith.constant 0 : index
    %15 = vector.load %arg6[%c0_12, %c0_13] : memref<8x128xf32, #tpu.memory_space<vmem>>, vector<8x128xf32>
    tpu.vector_store %arg6[%c0_12, %c0_13], %14 {strides = array<i32>} : memref<8x128xf32, #tpu.memory_space<vmem>>, vector<8x128xf32>,
    return
  }
  func.func @transform_0(%arg0: i32) -> (i32, i32) {
    %c0_i32 = arith.constant 0 : i32
    %c0_i32_0 = arith.constant 0 : i32
    return %arg0, %c0_i32 : i32, i32
  }
  func.func @transform_1(%arg0: i32) -> (i32, i32) {
    %c0_i32 = arith.constant 0 : i32
    %c0_i32_0 = arith.constant 0 : i32
    %c0_i32_1 = arith.constant 0 : i32
    return %c0_i32, %c0_i32_0 : i32, i32
  }
  func.func @transform_2(%arg0: i32) -> (i32, i32) {
    %c0_i32 = arith.constant 0 : i32
    %c0_i32_0 = arith.constant 0 : i32
    %c0_i32_1 = arith.constant 0 : i32
    return %c0_i32, %c0_i32_0 : i32, i32
  }
  func.func @transform_3(%arg0: i32) -> (i32, i32) {
    %c0_i32 = arith.constant 0 : i32
    %c0_i32_0 = arith.constant 0 : i32
    %c0_i32_1 = arith.constant 0 : i32
    return %c0_i32, %c0_i32_0 : i32, i32
  }
  func.func @transform_4(%arg0: i32) -> (i32, i32) {
    %c0_i32 = arith.constant 0 : i32
    %c0_i32_0 = arith.constant 0 : i32
    %c0_i32_1 = arith.constant 0 : i32
    return %c0_i32, %c0_i32_0 : i32, i32
  }
  func.func @transform_5(%arg0: i32) -> (i32, i32) {
    %c0_i32 = arith.constant 0 : i32
    %c0_i32_0 = arith.constant 0 : i32
    return %arg0, %c0_i32 : i32, i32
  }
}

</mosaic_0001>

<bundles_post_ra>
// kernel: tpu_custom_call.1
= control target key start
LH: loop header
LB: loop body
LE: loop exit
PB: predicated region body
PF: predicated region fallthrough
CT: control target
= control target key end

     0   :  { %10 = vsyncpa [#allocation3], 0  ;;  %s1143_s0 = inlined_call_operand.hbm [shape: f32[8,1024], index: 0, kind: input, shape index: {}]   ;;  %s1144_s1 = inlined_call_operand.hbm [shape: f32[1024,128], index: 1, kind: input, shape index: {}]   ;;  %s1145_s2 = inlined_call_operand.vmem [shape: f32[1,128], index: 2, kind: input, shape index: {}]   ;;  %s1146_s3 = inlined_call_operand.hbm [shape: f32[128,128], index: 3, kind: input, shape index: {}]   ;;  %s1147_s4 = inlined_call_operand.vmem [shape: f32[1,128], index: 4, kind: input, shape index: {}]   ;;  %s1148_s5 = inlined_call_operand.hbm [shape: f32[8,128], index: 5, kind: output, shape index: {}]  }
   0x1   :  { %11 = vsyncpa [#allocation6], 0 }
   0x2   :  { %12 = vsyncpa [#allocation4], 0  ;;  %s1044_s18 = smov [#allocation5]   ;;  %s950_s22 = scalar_lea.hbm %s1144_s1, 16384 }
   0x3   :  { %s28_s19 = sshll.u32 %s1044_s18, 4  ;;  %p951_p0 = scmp.ne.s32.totalorder %s1144_s1, %s950_s22  ;;  %s29_s19 = int_to_ptr.vmem [resolvable:$true] %s28_s19 }
   0x4   :  { %p954_p1 = scmp.lt.u32.totalorder %s950_s22, %s1144_s1 }
   0x6   :  { %p956_p2 = pnand %p954_p1, %p951_p0 }
   0x8   :  { %959 = shalt.err (!%p956_p2)
}
   0x9   :  { %s960_s27 = scalar_lea.vmem %s29_s19, 16384  ;;  %p965_p4 = scmp.lt.s32.totalorder %s29_s19, %s29_s19 }
   0xa   :  { %p961_p3 = scmp.ne.s32.totalorder %s29_s19, %s960_s27  ;;  %p966_p5 = scmp.lt.s32.totalorder %s960_s27, %s960_s27 }
   0xc   :  { %p967_p6 = por %p966_p5, %p965_p4 }
   0xe   :  { %p968_p7 = pnand %p967_p6, %p961_p3 }
  0x10   :  { %971 = shalt.err (!%p968_p7)
}
  0x11   :  { %s1045_s28 = smov 128   ;;  %s1046_s29 = smov 8  }
  0x12   :  { %34 = dma.hbm_to_vmem [thread:$0]  %s1144_s1, 16384, %s29_s19, [#allocation6], %s1045_s28, %s1045_s28, %s1046_s29  }
  0x13   :  { %s1047_s7 = smov [#allocation2]   ;;  %s1048_s9 = smov [#allocation7]  }
  0x14   :  { %s19_s8 = sshll.u32 %s1047_s7, 4  ;;  %s42_s10 = sshll.u32 %s1048_s9, 4  ;;  %s20_s8 = int_to_ptr.vmem [resolvable:$true] %s19_s8  ;;  %s43_s10 = int_to_ptr.vmem [resolvable:$true] %s42_s10 }
  0x15   :  { %s972_s13 = scalar_lea.hbm %s1143_s0, 1024 }
  0x16   :  { %p973_p8 = scmp.ne.s32.totalorder %s1143_s0, %s972_s13  ;;  %p976_p9 = scmp.lt.u32.totalorder %s972_s13, %s1143_s0 }
  0x18   :  { %p978_p10 = pnand %p976_p9, %p973_p8 }
  0x1a   :  { %981 = shalt.err (!%p978_p10)
}
  0x1b   :  { %s982_s1 = scalar_lea.vmem %s20_s8, 1024  ;;  %p987_p12 = scmp.lt.s32.totalorder %s20_s8, %s20_s8 }
  0x1c   :  { %p983_p11 = scmp.ne.s32.totalorder %s20_s8, %s982_s1  ;;  %p988_p13 = scmp.lt.s32.totalorder %s982_s1, %s982_s1 }
  0x1e   :  { %p989_p0 = por %p988_p13, %p987_p12 }
  0x20   :  { %p990_p1 = pnand %p989_p0, %p983_p11 }
  0x22   :  { %993 = shalt.err (!%p990_p1)
}
  0x23   :  { %22 = dma.hbm_to_vmem [thread:$0]  %s1143_s0, 1024, %s20_s8, [#allocation3]  }
  0x24   :  { %s994_s22 = scalar_lea.hbm %s1146_s3, 2048 }
  0x25   :  { %p995_p2 = scmp.ne.s32.totalorder %s1146_s3, %s994_s22  ;;  %p998_p3 = scmp.lt.u32.totalorder %s994_s22, %s1146_s3 }
  0x27   :  { %p1000_p4 = pnand %p998_p3, %p995_p2 }
  0x29   :  { %1003 = shalt.err (!%p1000_p4)
}
  0x2a   :  { %s1004_s27 = scalar_lea.vmem %s43_s10, 2048  ;;  %p1009_p6 = scmp.lt.s32.totalorder %s43_s10, %s43_s10 }
  0x2b   :  { %p1005_p5 = scmp.ne.s32.totalorder %s43_s10, %s1004_s27  ;;  %p1010_p7 = scmp.lt.s32.totalorder %s1004_s27, %s1004_s27 }
  0x2d   :  { %p1011_p8 = por %p1010_p7, %p1009_p6 }
  0x2f   :  { %p1012_p9 = pnand %p1011_p8, %p1005_p5 }
  0x31   :  { %1015 = shalt.err (!%p1012_p9)
}
  0x32   :  { %48 = dma.hbm_to_vmem [thread:$0]  %s1146_s3, 2048, %s43_s10, [#allocation6], %s1045_s28, %s1045_s28, %s1046_s29  }
  0x33   :  { %1038 = dma.done.wait [#allocation3], 1024  }
  0x34   :  { %1039 = vsyncadd [#allocation3], 4294966272 }
  0x35   :  { %1040 = dma.done.wait [#allocation6], 18432  }
  0x36   :  { %1041 = vsyncadd [#allocation6], 4294948864  ;;  %v84_v0 = vld [vmem:[#allocation5 + $0x80] sm:$0xff]  ;;  %v85_v1 = vld [vmem:[#allocation5 + $0x88] sm:$0xff]  ;;  %vm1050_vm0 = vmmov 0  }
  0x37   :  { %v68_v2 = vld [vmem:[#allocation5] sm:$0xff]  ;;  %v789_v3 = vpack.c.bf16 %v85_v1, %v84_v0  ;;  %v69_v4 = vld [vmem:[#allocation5 + $0x8] sm:$0xff]  ;;  %v86_v11 = vld [vmem:[#allocation5 + $0x90] sm:$0xff] }
  0x38   :  { %v116_v5 = vld [vmem:[#allocation5 + $0x180] sm:$0xff]  ;;  %v117_v6 = vld [vmem:[#allocation5 + $0x188] sm:$0xff]  ;;  %v791_v7 = vpack.c.bf16 %v69_v4, %v68_v2  ;;  %v87_v13 = vld [vmem:[#allocation5 + $0x98] sm:$0xff] }
  0x39   :  { %v821_v8 = vpack.c.bf16 %v117_v6, %v116_v5  ;;  %v100_v9 = vld [vmem:[#allocation5 + $0x100] sm:$0xff]  ;;  %v101_v10 = vld [vmem:[#allocation5 + $0x108] sm:$0xff]  ;;  %790 = vmatprep.subr.bf16.mxu0 %v789_v3  ;;  %v70_v14 = vld [vmem:[#allocation5 + $0x10] sm:$0xff]  ;;  %v793_v16 = vpack.c.bf16 %v87_v13, %v86_v11 }
  0x3a   :  { %v823_v12 = vpack.c.bf16 %v101_v10, %v100_v9  ;;  %v71_v15 = vld [vmem:[#allocation5 + $0x18] sm:$0xff]  ;;  %792 = vmatpush3.bf16.msra.mxu0 %v791_v7  ;;  %v118_v18 = vld [vmem:[#allocation5 + $0x190] sm:$0xff]  ;;  %v88_v23 = vld [vmem:[#allocation5 + $0xa0] sm:$0xff] }
  0x3b   :  { %822 = vmatprep.subr.bf16.mxu1 %v821_v8  ;;  %v795_v17 = vpack.c.bf16 %v71_v15, %v70_v14  ;;  %v119_v19 = vld [vmem:[#allocation5 + $0x198] sm:$0xff]  ;;  %v102_v20 = vld [vmem:[#allocation5 + $0x110] sm:$0xff]  ;;  %v89_v24 = vld [vmem:[#allocation5 + $0xa8] sm:$0xff]  ;;  %794 = vmatprep.subr.bf16.mxu0 %v793_v16 }
  0x3c   :  { %824 = vmatpush3.bf16.msra.mxu1 %v823_v12  ;;  %v825_v21 = vpack.c.bf16 %v119_v19, %v118_v18  ;;  %v103_v22 = vld [vmem:[#allocation5 + $0x118] sm:$0xff]  ;;  %v797_v26 = vpack.c.bf16 %v89_v24, %v88_v23  ;;  %v72_v27 = vld [vmem:[#allocation5 + $0x20] sm:$0xff]  ;;  %v73_v28 = vld [vmem:[#allocation5 + $0x28] sm:$0xff] }
  0x3d   :  { %v827_v25 = vpack.c.bf16 %v103_v22, %v102_v20  ;;  %v120_v29 = vld [vmem:[#allocation5 + $0x1a0] sm:$0xff]  ;;  %v121_v30 = vld [vmem:[#allocation5 + $0x1a8] sm:$0xff]  ;;  %v799_v33 = vpack.c.bf16 %v73_v28, %v72_v27  ;;  %v90_v35 = vld [vmem:[#allocation5 + $0xb0] sm:$0xff] }
  0x3e   :  { %826 = vmatprep.subr.bf16.mxu1 %v825_v21  ;;  %v104_v31 = vld [vmem:[#allocation5 + $0x120] sm:$0xff]  ;;  %v105_v32 = vld [vmem:[#allocation5 + $0x128] sm:$0xff]  ;;  %796 = vmatpush3.bf16.msra.mxu0 %v795_v17  ;;  %v829_v34 = vpack.c.bf16 %v121_v30, %v120_v29  ;;  %v91_v36 = vld [vmem:[#allocation5 + $0xb8] sm:$0xff] }
  0x3f   :  { %v74_v37 = vld [vmem:[#allocation5 + $0x30] sm:$0xff]  ;;  %798 = vmatprep.subr.bf16.mxu0 %v797_v26  ;;  %v831_v38 = vpack.c.bf16 %v105_v32, %v104_v31  ;;  %v801_v39 = vpack.c.bf16 %v91_v36, %v90_v35  ;;  %v75_v40 = vld [vmem:[#allocation5 + $0x38] sm:$0xff]  ;;  %v92_v46 = vld [vmem:[#allocation5 + $0xc0] sm:$0xff] }
  0x40   :  { %828 = vmatpush3.bf16.msra.mxu1 %v827_v25  ;;  %v122_v41 = vld [vmem:[#allocation5 + $0x1b0] sm:$0xff]  ;;  %v123_v42 = vld [vmem:[#allocation5 + $0x1b8] sm:$0xff]  ;;  %v93_v47 = vld [vmem:[#allocation5 + $0xc8] sm:$0xff]  ;;  %v803_v48 = vpack.c.bf16 %v75_v40, %v74_v37 }
  0x41   :  { %830 = vmatprep.subr.bf16.mxu1 %v829_v34  ;;  %v833_v43 = vpack.c.bf16 %v123_v42, %v122_v41  ;;  %v106_v44 = vld [vmem:[#allocation5 + $0x130] sm:$0xff]  ;;  %v107_v45 = vld [vmem:[#allocation5 + $0x138] sm:$0xff]  ;;  %v124_v49 = vld [vmem:[#allocation5 + $0x1c0] sm:$0xff]  ;;  %v805_v52 = vpack.c.bf16 %v93_v47, %v92_v46 }
  0x42   :  { %800 = vmatpush3.bf16.msra.mxu0 %v799_v33  ;;  %v125_v50 = vld [vmem:[#allocation5 + $0x1c8] sm:$0xff]  ;;  %v835_v51 = vpack.c.bf16 %v107_v45, %v106_v44  ;;  %v76_v53 = vld [vmem:[#allocation5 + $0x40] sm:$0xff]  ;;  %v94_v58 = vld [vmem:[#allocation5 + $0xd0] sm:$0xff] }
  0x43   :  { %802 = vmatprep.subr.bf16.mxu0 %v801_v39  ;;  %v77_v54 = vld [vmem:[#allocation5 + $0x48] sm:$0xff]  ;;  %v108_v55 = vld [vmem:[#allocation5 + $0x140] sm:$0xff]  ;;  %v837_v56 = vpack.c.bf16 %v125_v50, %v124_v49  ;;  %v95_v59 = vld [vmem:[#allocation5 + $0xd8] sm:$0xff] }
  0x44   :  { %832 = vmatpush3.bf16.msra.mxu1 %v831_v38  ;;  %v109_v57 = vld [vmem:[#allocation5 + $0x148] sm:$0xff]  ;;  %v126_v60 = vld [vmem:[#allocation5 + $0x1d0] sm:$0xff]  ;;  %v127_v61 = vld [vmem:[#allocation5 + $0x1d8] sm:$0xff]  ;;  %v807_v62 = vpack.c.bf16 %v77_v54, %v76_v53  ;;  %v809_v0 = vpack.c.bf16 %v95_v59, %v94_v58 }
  0x45   :  { %834 = vmatprep.subr.bf16.mxu1 %v833_v43  ;;  %v839_v63 = vpack.c.bf16 %v109_v57, %v108_v55  ;;  %v78_v1 = vld [vmem:[#allocation5 + $0x50] sm:$0xff]  ;;  %v79_v2 = vld [vmem:[#allocation5 + $0x58] sm:$0xff]  ;;  %v841_v4 = vpack.c.bf16 %v127_v61, %v126_v60  ;;  %v96_v6 = vld [vmem:[#allocation5 + $0xe0] sm:$0xff] }
  0x46   :  { %804 = vmatpush3.bf16.msra.mxu0 %v803_v48  ;;  %v110_v3 = vld [vmem:[#allocation5 + $0x150] sm:$0xff]  ;;  %v111_v5 = vld [vmem:[#allocation5 + $0x158] sm:$0xff]  ;;  %v97_v7 = vld [vmem:[#allocation5 + $0xe8] sm:$0xff]  ;;  %v811_v10 = vpack.c.bf16 %v79_v2, %v78_v1 }
  0x47   :  { %806 = vmatprep.subr.bf16.mxu0 %v805_v52  ;;  %v128_v8 = vld [vmem:[#allocation5 + $0x1e0] sm:$0xff]  ;;  %v129_v9 = vld [vmem:[#allocation5 + $0x1e8] sm:$0xff]  ;;  %v843_v13 = vpack.c.bf16 %v111_v5, %v110_v3  ;;  %v813_v14 = vpack.c.bf16 %v97_v7, %v96_v6  ;;  %v98_v19 = vld [vmem:[#allocation5 + $0xf0] sm:$0xff] }
  0x48   :  { %836 = vmatpush3.bf16.msra.mxu1 %v835_v51  ;;  %v80_v11 = vld [vmem:[#allocation5 + $0x60] sm:$0xff]  ;;  %v81_v12 = vld [vmem:[#allocation5 + $0x68] sm:$0xff]  ;;  %v845_v18 = vpack.c.bf16 %v129_v9, %v128_v8  ;;  %v99_v20 = vld [vmem:[#allocation5 + $0xf8] sm:$0xff] }
  0x49   :  { %838 = vmatprep.subr.bf16.mxu1 %v837_v56  ;;  %v112_v15 = vld [vmem:[#allocation5 + $0x160] sm:$0xff]  ;;  %v113_v16 = vld [vmem:[#allocation5 + $0x168] sm:$0xff]  ;;  %v63_v21 = vld [vmem:[#allocation2 + $0x18] sm:$0xff]  ;;  %v815_v24 = vpack.c.bf16 %v81_v12, %v80_v11  ;;  %v817_v26 = vpack.c.bf16 %v99_v20, %v98_v19 }
  0x4a   :  { %808 = vmatpush3.bf16.msra.mxu0 %v807_v62  ;;  %v61_v17 = vld [vmem:[#allocation2 + $0x8] sm:$0xff]  ;;  %v130_v22 = vld [vmem:[#allocation5 + $0x1f0] sm:$0xff]  ;;  %v131_v23 = vld [vmem:[#allocation5 + $0x1f8] sm:$0xff]  ;;  %337 = vmatprep.mubr.f32.mxu1 %v63_v21  ;;  %v847_v25 = vpack.c.bf16 %v113_v16, %v112_v15 }
  0x4b   :  { %810 = vmatprep.subr.bf16.mxu0 %v809_v0  ;;  %267 = vmatprep.mubr.f32.mxu0 %v61_v17  ;;  %v82_v27 = vld [vmem:[#allocation5 + $0x70] sm:$0xff]  ;;  %v83_v28 = vld [vmem:[#allocation5 + $0x78] sm:$0xff]  ;;  %v849_v30 = vpack.c.bf16 %v131_v23, %v130_v22  ;;  %v148_v32 = vld [vmem:[#allocation5 + $0x280] sm:$0xff] }
  0x4c   :  { %840 = vmatpush3.bf16.msra.mxu1 %v839_v63  ;;  %v114_v29 = vld [vmem:[#allocation5 + $0x170] sm:$0xff]  ;;  %v115_v31 = vld [vmem:[#allocation5 + $0x178] sm:$0xff]  ;;  %v149_v33 = vld [vmem:[#allocation5 + $0x288] sm:$0xff]  ;;  %v819_v36 = vpack.c.bf16 %v83_v28, %v82_v27 }
  0x4d   :  { %842 = vmatprep.subr.bf16.mxu1 %v841_v4  ;;  %v180_v34 = vld [vmem:[#allocation5 + $0x380] sm:$0xff]  ;;  %v181_v35 = vld [vmem:[#allocation5 + $0x388] sm:$0xff]  ;;  %v851_v37 = vpack.c.bf16 %v115_v31, %v114_v29  ;;  %v853_v38 = vpack.c.bf16 %v149_v33, %v148_v32  ;;  %v150_v44 = vld [vmem:[#allocation5 + $0x290] sm:$0xff] }
  0x4e   :  { %812 = vmatpush3.bf16.msra.mxu0 %v811_v10  ;;  %v132_v39 = vld [vmem:[#allocation5 + $0x200] sm:$0xff]  ;;  %v133_v40 = vld [vmem:[#allocation5 + $0x208] sm:$0xff]  ;;  %v885_v42 = vpack.c.bf16 %v181_v35, %v180_v34  ;;  %v151_v45 = vld [vmem:[#allocation5 + $0x298] sm:$0xff] }
  0x4f   :  { %814 = vmatprep.subr.bf16.mxu0 %v813_v14  ;;  %v164_v41 = vld [vmem:[#allocation5 + $0x300] sm:$0xff]  ;;  %v165_v43 = vld [vmem:[#allocation5 + $0x308] sm:$0xff]  ;;  %v182_v46 = vld [vmem:[#allocation5 + $0x390] sm:$0xff]  ;;  %v855_v49 = vpack.c.bf16 %v133_v40, %v132_v39  ;;  %v857_v52 = vpack.c.bf16 %v151_v45, %v150_v44 }
  0x50   :  { %844 = vmatpush3.bf16.msra.mxu1 %v843_v13  ;;  %v183_v47 = vld [vmem:[#allocation5 + $0x398] sm:$0xff]  ;;  %v60_v48 = vld [vmem:[#allocation2] sm:$0xff]  ;;  %v62_v50 = vld [vmem:[#allocation2 + $0x10] sm:$0xff]  ;;  %v887_v51 = vpack.c.bf16 %v165_v43, %v164_v41 }
  0x51   :  { %846 = vmatprep.subr.bf16.mxu1 %v845_v18  ;;  %v134_v53 = vld [vmem:[#allocation5 + $0x210] sm:$0xff]  ;;  %v135_v54 = vld [vmem:[#allocation5 + $0x218] sm:$0xff]  ;;  %v889_v56 = vpack.c.bf16 %v183_v47, %v182_v46  ;;  %v152_v58 = vld [vmem:[#allocation5 + $0x2a0] sm:$0xff] }
  0x52   :  { %816 = vmatpush3.bf16.msra.mxu0 %v815_v24  ;;  %v166_v55 = vld [vmem:[#allocation5 + $0x310] sm:$0xff]  ;;  %v167_v57 = vld [vmem:[#allocation5 + $0x318] sm:$0xff]  ;;  %v153_v59 = vld [vmem:[#allocation5 + $0x2a8] sm:$0xff]  ;;  %v859_v62 = vpack.c.bf16 %v135_v54, %v134_v53 }
  0x53   :  { %818 = vmatprep.subr.bf16.mxu0 %v817_v26  ;;  %v184_v60 = vld [vmem:[#allocation5 + $0x3a0] sm:$0xff]  ;;  %v185_v61 = vld [vmem:[#allocation5 + $0x3a8] sm:$0xff]  ;;  %v891_v63 = vpack.c.bf16 %v167_v57, %v166_v55  ;;  %v861_v0 = vpack.c.bf16 %v153_v59, %v152_v58  ;;  %v154_v6 = vld [vmem:[#allocation5 + $0x2b0] sm:$0xff] }
  0x54   :  { %848 = vmatpush3.bf16.msra.mxu1 %v847_v25  ;;  %v136_v1 = vld [vmem:[#allocation5 + $0x220] sm:$0xff]  ;;  %v137_v2 = vld [vmem:[#allocation5 + $0x228] sm:$0xff]  ;;  %v893_v4 = vpack.c.bf16 %v185_v61, %v184_v60  ;;  %v155_v7 = vld [vmem:[#allocation5 + $0x2b8] sm:$0xff] }
  0x55   :  { %850 = vmatprep.subr.bf16.mxu1 %v849_v30  ;;  %v168_v3 = vld [vmem:[#allocation5 + $0x320] sm:$0xff]  ;;  %v169_v5 = vld [vmem:[#allocation5 + $0x328] sm:$0xff]  ;;  %v186_v8 = vld [vmem:[#allocation5 + $0x3b0] sm:$0xff]  ;;  %v863_v10 = vpack.c.bf16 %v137_v2, %v136_v1  ;;  %v865_v12 = vpack.c.bf16 %v155_v7, %v154_v6 }
  0x56   :  { %820 = vmatpush3.bf16.msra.mxu0 %v819_v36  ;;  %v187_v9 = vld [vmem:[#allocation5 + $0x3b8] sm:$0xff]  ;;  %v895_v11 = vpack.c.bf16 %v169_v5, %v168_v3  ;;  %v138_v13 = vld [vmem:[#allocation5 + $0x230] sm:$0xff]  ;;  %v156_v18 = vld [vmem:[#allocation5 + $0x2c0] sm:$0xff] }
  0x57   :  { %854 = vmatprep.subr.bf16.mxu0 %v853_v38  ;;  %v139_v14 = vld [vmem:[#allocation5 + $0x238] sm:$0xff]  ;;  %v170_v15 = vld [vmem:[#allocation5 + $0x330] sm:$0xff]  ;;  %v897_v16 = vpack.c.bf16 %v187_v9, %v186_v8  ;;  %v157_v19 = vld [vmem:[#allocation5 + $0x2c8] sm:$0xff] }
  0x58   :  { %852 = vmatpush3.bf16.msra.mxu1 %v851_v37  ;;  %v171_v17 = vld [vmem:[#allocation5 + $0x338] sm:$0xff]  ;;  %v188_v20 = vld [vmem:[#allocation5 + $0x3c0] sm:$0xff]  ;;  %v189_v21 = vld [vmem:[#allocation5 + $0x3c8] sm:$0xff]  ;;  %v867_v22 = vpack.c.bf16 %v139_v14, %v138_v13  ;;  %v869_v26 = vpack.c.bf16 %v157_v19, %v156_v18 }
  0x59   :  { %886 = vmatprep.subr.bf16.mxu1 %v885_v42  ;;  %268 = vmatmul.mubr.f32.vlgmr.msra.gmra.mrb[0].mxu0 %v60_v48  ;;  %v65_v23 = vld [vmem:[#allocation2 + $0x28] sm:$0xff]  ;;  %v67_v24 = vld [vmem:[#allocation2 + $0x38] sm:$0xff]  ;;  %v899_v25 = vpack.c.bf16 %v171_v17, %v170_v15  ;;  %v140_v27 = vld [vmem:[#allocation5 + $0x240] sm:$0xff]  ;;  %v901_v30 = vpack.c.bf16 %v189_v21, %v188_v20 }
  0x5a   :  { %856 = vmatpush3.bf16.msra.mxu0 %v855_v49  ;;  %v141_v28 = vld [vmem:[#allocation5 + $0x248] sm:$0xff]  ;;  %v172_v29 = vld [vmem:[#allocation5 + $0x340] sm:$0xff]  ;;  %v158_v32 = vld [vmem:[#allocation5 + $0x2d0] sm:$0xff]  ;;  %407 = vmatprep.mubr.f32.mxu0 %v65_v23 }
  0x5b   :  { %338 = vmatmul.mubr.f32.vlgmr.msra.gmra.mrb[0].mxu1 %v62_v50  ;;  %858 = vmatprep.subr.bf16.mxu0 %v857_v52  ;;  %v173_v31 = vld [vmem:[#allocation5 + $0x348] sm:$0xff]  ;;  %v159_v33 = vld [vmem:[#allocation5 + $0x2d8] sm:$0xff]  ;;  %v190_v34 = vld [vmem:[#allocation5 + $0x3d0] sm:$0xff]  ;;  %v871_v36 = vpack.c.bf16 %v141_v28, %v140_v27 }
  0x5c   :  { %888 = vmatpush3.bf16.msra.mxu1 %v887_v51  ;;  %v191_v35 = vld [vmem:[#allocation5 + $0x3d8] sm:$0xff]  ;;  %477 = vmatprep.mubr.f32.mxu1 %v67_v24  ;;  %v903_v37 = vpack.c.bf16 %v173_v31, %v172_v29  ;;  %v873_v38 = vpack.c.bf16 %v159_v33, %v158_v32  ;;  %v142_v39 = vld [vmem:[#allocation5 + $0x250] sm:$0xff]  ;;  %v160_v44 = vld [vmem:[#allocation5 + $0x2e0] sm:$0xff]  ;;  %v1051_v33 = vmov 0.0  }
  0x5d   :  { %890 = vmatprep.subr.bf16.mxu1 %v889_v56  ;;  %v143_v40 = vld [vmem:[#allocation5 + $0x258] sm:$0xff]  ;;  %v174_v41 = vld [vmem:[#allocation5 + $0x350] sm:$0xff]  ;;  %v905_v42 = vpack.c.bf16 %v191_v35, %v190_v34  ;;  %v161_v45 = vld [vmem:[#allocation5 + $0x2e8] sm:$0xff] }
  0x5e   :  { %860 = vmatpush3.bf16.msra.mxu0 %v859_v62  ;;  %v175_v43 = vld [vmem:[#allocation5 + $0x358] sm:$0xff]  ;;  %v192_v46 = vld [vmem:[#allocation5 + $0x3e0] sm:$0xff]  ;;  %v193_v47 = vld [vmem:[#allocation5 + $0x3e8] sm:$0xff]  ;;  %v875_v48 = vpack.c.bf16 %v143_v40, %v142_v39  ;;  %v877_v50 = vpack.c.bf16 %v161_v45, %v160_v44 }
  0x5f   :  { %862 = vmatprep.subr.bf16.mxu0 %v861_v0  ;;  %v907_v49 = vpack.c.bf16 %v175_v43, %v174_v41  ;;  %v144_v51 = vld [vmem:[#allocation5 + $0x260] sm:$0xff]  ;;  %v145_v52 = vld [vmem:[#allocation5 + $0x268] sm:$0xff]  ;;  %v909_v54 = vpack.c.bf16 %v193_v47, %v192_v46  ;;  %v162_v56 = vld [vmem:[#allocation5 + $0x2f0] sm:$0xff] }
  0x60   :  { %892 = vmatpush3.bf16.msra.mxu1 %v891_v63  ;;  %v176_v53 = vld [vmem:[#allocation5 + $0x360] sm:$0xff]  ;;  %v177_v55 = vld [vmem:[#allocation5 + $0x368] sm:$0xff]  ;;  %v163_v57 = vld [vmem:[#allocation5 + $0x2f8] sm:$0xff]  ;;  %v879_v60 = vpack.c.bf16 %v145_v52, %v144_v51 }
  0x61   :  { %894 = vmatprep.subr.bf16.mxu1 %v893_v4  ;;  %v194_v58 = vld [vmem:[#allocation5 + $0x3f0] sm:$0xff]  ;;  %v195_v59 = vld [vmem:[#allocation5 + $0x3f8] sm:$0xff]  ;;  %v911_v61 = vpack.c.bf16 %v177_v55, %v176_v53  ;;  %v881_v62 = vpack.c.bf16 %v163_v57, %v162_v56  ;;  %v64_v6 = vld [vmem:[#allocation2 + $0x20] sm:$0xff] }
  0x62   :  { %864 = vmatpush3.bf16.msra.mxu0 %v863_v10  ;;  %v146_v63 = vld [vmem:[#allocation5 + $0x270] sm:$0xff]  ;;  %v147_v0 = vld [vmem:[#allocation5 + $0x278] sm:$0xff]  ;;  %v913_v1 = vpack.c.bf16 %v195_v59, %v194_v58  ;;  %v484_v8 = vld [vmem:[#allocation7] sm:$0xff] }
  0x63   :  { %866 = vmatprep.subr.bf16.mxu0 %v865_v12  ;;  %v178_v2 = vld [vmem:[#allocation5 + $0x370] sm:$0xff]  ;;  %v179_v3 = vld [vmem:[#allocation5 + $0x378] sm:$0xff]  ;;  %v883_v4 = vpack.c.bf16 %v147_v0, %v146_v63  ;;  %v485_v9 = vld [vmem:[#allocation7 + $0x8] sm:$0xff] }
  0x64   :  { %896 = vmatpush3.bf16.msra.mxu1 %v895_v11  ;;  %v915_v5 = vpack.c.bf16 %v179_v3, %v178_v2  ;;  %v66_v7 = vld [vmem:[#allocation2 + $0x30] sm:$0xff]  ;;  %v1049_v11 = vmov 0.0|0.0   ;;  %v918_v12 = vpack.c.bf16 %v485_v9, %v484_v8  ;;  %v487_v13 = vld [vmem:[#allocation7 + $0x18] sm:$0xff]  ;;  %v488_v15 = vld [vmem:[#allocation7 + $0x20] sm:$0xff] }
  0x65   :  { %898 = vmatprep.subr.bf16.mxu1 %v897_v16  ;;  %v486_v10 = vld [vmem:[#allocation7 + $0x10] sm:$0xff]  ;;  %v489_v16 = vld [vmem:[#allocation7 + $0x28] sm:$0xff]  ;;  %v491_v19 = vld [vmem:[#allocation7 + $0x38] sm:$0xff] }
  0x66   :  { %868 = vmatpush3.bf16.msra.mxu0 %v867_v22  ;;  %v921_v14 = vpack.c.bf16 %v487_v13, %v486_v10  ;;  %v924_v17 = vpack.c.bf16 %v489_v16, %v488_v15  ;;  %v490_v18 = vld [vmem:[#allocation7 + $0x30] sm:$0xff]  ;;  %v492_v21 = vld [vmem:[#allocation7 + $0x40] sm:$0xff]  ;;  %v493_v22 = vld [vmem:[#allocation7 + $0x48] sm:$0xff] }
  0x67   :  { %870 = vmatprep.subr.bf16.mxu0 %v869_v26  ;;  %v927_v20 = vpack.c.bf16 %v491_v19, %v490_v18  ;;  %v930_v23 = vpack.c.bf16 %v493_v22, %v492_v21  ;;  %v494_v24 = vld [vmem:[#allocation7 + $0x50] sm:$0xff]  ;;  %v496_v27 = vld [vmem:[#allocation7 + $0x60] sm:$0xff]  ;;  %v497_v28 = vld [vmem:[#allocation7 + $0x68] sm:$0xff] }
  0x68   :  { %900 = vmatpush3.bf16.msra.mxu1 %v899_v25  ;;  %v495_v25 = vld [vmem:[#allocation7 + $0x58] sm:$0xff]  ;;  %v936_v29 = vpack.c.bf16 %v497_v28, %v496_v27  ;;  %v595_v35 = vld [vmem:[%s1145_s2] ss:$0 sm:$0xff]  ;;  %s1052_s2 = smov [#allocation8]  }
  0x69   :  { %902 = vmatprep.subr.bf16.mxu1 %v901_v30  ;;  %v933_v26 = vpack.c.bf16 %v495_v25, %v494_v24  ;;  %v498_v30 = vld [vmem:[#allocation7 + $0x70] sm:$0xff]  ;;  %v499_v31 = vld [vmem:[#allocation7 + $0x78] sm:$0xff]  ;;  %v596_v52 = vld [vmem:[%s1147_s4] ss:$0 sm:$0xff]  ;;  %s585_s7 = sshll.u32 %s1052_s2, 4  ;;  %s586_s7 = int_to_ptr.vmem [resolvable:$true] %s585_s7 }
  0x6a   :  { %872 = vmatpush3.bf16.msra.mxu0 %v871_v36  ;;  %v939_v32 = vpack.c.bf16 %v499_v31, %v498_v30  ;;  %s1016_s8 = scalar_lea.vmem %s586_s7, 128  ;;  %p1021_p11 = scmp.lt.s32.totalorder %s586_s7, %s586_s7 }
  0x6b   :  { %874 = vmatprep.subr.bf16.mxu0 %v873_v38  ;;  %p1017_p10 = scmp.ne.s32.totalorder %s586_s7, %s1016_s8  ;;  %p1022_p12 = scmp.lt.s32.totalorder %s1016_s8, %s1016_s8 }
  0x6c   :  { %904 = vmatpush3.bf16.msra.mxu1 %v903_v37 }
  0x6d   :  { %906 = vmatprep.subr.bf16.mxu1 %v905_v42  ;;  %p1023_p13 = por %p1022_p12, %p1021_p11 }
  0x6e   :  { %876 = vmatpush3.bf16.msra.mxu0 %v875_v48 }
  0x6f   :  { %878 = vmatprep.subr.bf16.mxu0 %v877_v50  ;;  %p1024_p0 = pnand %p1023_p13, %p1017_p10 }
  0x70   :  { %908 = vmatpush3.bf16.msra.mxu1 %v907_v49 }
  0x71   :  { %910 = vmatprep.subr.bf16.mxu1 %v909_v54 }
  0x72   :  { %880 = vmatpush3.bf16.msra.mxu0 %v879_v60 }
  0x73   :  { %882 = vmatprep.subr.bf16.mxu0 %v881_v62 }
  0x74   :  { %912 = vmatpush3.bf16.msra.mxu1 %v911_v61 }
  0x75   :  { %914 = vmatprep.subr.bf16.mxu1 %v913_v1 }
  0x76   :  { %884 = vmatpush3.bf16.msra.mxu0 %v883_v4 }
  0x77   :  { %917 = vmatprep.subr.bf16.mxu0 %v1049_v11 }
  0x78   :  { %916 = vmatpush3.bf16.msra.mxu1 %v915_v5 }
  0x79   :  { %408 = vmatmul.mubr.f32.vlgmr.msra.gmra.mrb[2].mxu0 %v64_v6 }
  0x7a   :  { %919 = vmatpush3.bf16.msra.mxu0 %v918_v12  ;;  %786 = vmatprep.mubr.msk.f32.mxu0 %vm1050_vm0, %v1051_v33 }
  0x7b   :  { %478 = vmatmul.mubr.f32.vlgmr.msra.gmra.mrb[2].mxu1 %v66_v7  ;;  %920 = vmatprep.subr.bf16.mxu0 %v1049_v11 }
  0x7e   :  { %922 = vmatpush3.bf16.msra.mxu0 %v921_v14 }
  0x7f   :  { %923 = vmatprep.subr.bf16.mxu0 %v1049_v11 }
  0x82   :  { %925 = vmatpush3.bf16.msra.mxu0 %v924_v17 }
  0x83   :  { %926 = vmatprep.subr.bf16.mxu0 %v1049_v11 }
  0x86   :  { %928 = vmatpush3.bf16.msra.mxu0 %v927_v20 }
  0x87   :  { %929 = vmatprep.subr.bf16.mxu0 %v1049_v11 }
  0x8a   :  { %931 = vmatpush3.bf16.msra.mxu0 %v930_v23 }
  0x8b   :  { %932 = vmatprep.subr.bf16.mxu0 %v1049_v11 }
  0x8e   :  { %934 = vmatpush3.bf16.msra.mxu0 %v933_v26 }
  0x8f   :  { %935 = vmatprep.subr.bf16.mxu0 %v1049_v11 }
  0x92   :  { %937 = vmatpush3.bf16.msra.mxu0 %v936_v29 }
  0x93   :  { %938 = vmatprep.subr.bf16.mxu0 %v1049_v11 }
  0x96   :  { %940 = vmatpush3.bf16.msra.mxu0 %v939_v32 }
 0x12c   :  { %v629_v34 = vpop.f32.mrb[0].mxu0 }
 0x12d   :  { %v630_v36 = vpop.f32.mrb[1].mxu0 }
 0x12e   :  { %v664_v37 = vpop.f32.mrb[0].mxu1  ;;  %v631_v38 = vadd.f32 %v630_v36, %v629_v34 }
 0x12f   :  { %v665_v39 = vpop.f32.mrb[1].mxu1 }
 0x130   :  { %v666_v40 = vadd.f32 %v665_v39, %v664_v37  ;;  %v270_v41 = vadd.f32 %v631_v38, %v595_v35 }
 0x132   :  { %v340_v42 = vadd.f32 %v666_v40, %v270_v41 }
 0x14c   :  { %v699_v43 = vpop.f32.mrb[2].mxu0 }
 0x14d   :  { %v700_v44 = vpop.f32.mrb[3].mxu0 }
 0x14e   :  { %v734_v45 = vpop.f32.mrb[2].mxu1  ;;  %v701_v46 = vadd.f32 %v700_v44, %v699_v43 }
 0x14f   :  { %v735_v47 = vpop.f32.mrb[3].mxu1 }
 0x150   :  { %v736_v48 = vadd.f32 %v735_v47, %v734_v45  ;;  %v410_v49 = vadd.f32 %v701_v46, %v340_v42 }
 0x152   :  { %v480_v50 = vadd.f32 %v736_v48, %v410_v49 }
 0x154   :  { %v483_v51 = vmax.f32 %v480_v50, 0.0 }
 0x156   :  { %787 = vmatmul.mubr.f32.vlgmr.msra.gmra.mrb[4].mxu0 %v483_v51 }
 0x229   :  { %v573_v53 = vpop.f32.mrb[4].mxu0 }
 0x22a   :  { %v574_v54 = vadd.f32 %v596_v52, %v573_v53  ;;  %v788_v55 = vpop.f32.mrb[5].mxu0 }
 0x22c   :  { %v577_v56 = vmax.f32 %v574_v54, 0.0 }
 0x22e   :  { %578 = vst [vmem:[#allocation8] sm:$0xff] %v577_v56 }
 0x22f   :  { %1027 = shalt.err (!%p1024_p0)
}
 0x230   :  { %s1028_s11 = scalar_lea.hbm %s1148_s5, 128 }
 0x231   :  { %p1029_p1 = scmp.ne.s32.totalorder %s1148_s5, %s1028_s11  ;;  %p1032_p2 = scmp.lt.u32.totalorder %s1028_s11, %s1148_s5 }
 0x233   :  { %p1034_p3 = pnand %p1032_p2, %p1029_p1 }
 0x235   :  { %1037 = shalt.err (!%p1034_p3)
}
 0x236   :  { %588 = dma.vmem_to_hbm [thread:$0]  %s586_s7, 128, %s1148_s5, [#allocation4]  }
 0x237   :  { %1042 = dma.done.wait [#allocation4], 128  }
 0x238   :  { %1043 = vsyncadd [#allocation4], 4294967168 }
 0x239   :  { %592 = vsyncpa [#allocation3], 1 }
 0x23a   :  { %593 = vsyncpa [#allocation6], 1 }
 0x23b   :  { %594 = vsyncpa [#allocation4], 1 }

// kernel: tpu_custom_call.1
= control target key start
LH: loop header
LB: loop body
LE: loop exit
PB: predicated region body
PF: predicated region fallthrough
CT: control target
= control target key end

     0   :  { %10 = vsyncpa [#allocation3], 0  ;;  %s1143_s0 = inlined_call_operand.hbm [shape: f32[8,1024], index: 0, kind: input, shape index: {}]   ;;  %s1144_s1 = inlined_call_operand.hbm [shape: f32[1024,128], index: 1, kind: input, shape index: {}]   ;;  %s1145_s2 = inlined_call_operand.vmem [shape: f32[1,128], index: 2, kind: input, shape index: {}]   ;;  %s1146_s3 = inlined_call_operand.hbm [shape: f32[128,128], index: 3, kind: input, shape index: {}]   ;;  %s1147_s4 = inlined_call_operand.vmem [shape: f32[1,128], index: 4, kind: input, shape index: {}]   ;;  %s1148_s5 = inlined_call_operand.hbm [shape: f32[8,128], index: 5, kind: output, shape index: {}]  }
   0x1   :  { %11 = vsyncpa [#allocation6], 0 }
   0x2   :  { %12 = vsyncpa [#allocation4], 0  ;;  %s1044_s18 = smov [#allocation5]   ;;  %s950_s22 = scalar_lea.hbm %s1144_s1, 16384 }
   0x3   :  { %s28_s19 = sshll.u32 %s1044_s18, 4  ;;  %p951_p0 = scmp.ne.s32.totalorder %s1144_s1, %s950_s22  ;;  %s29_s19 = int_to_ptr.vmem [resolvable:$true] %s28_s19 }
   0x4   :  { %p954_p1 = scmp.lt.u32.totalorder %s950_s22, %s1144_s1 }
   0x6   :  { %p956_p2 = pnand %p954_p1, %p951_p0 }
   0x8   :  { %959 = shalt.err (!%p956_p2)
}
   0x9   :  { %s960_s27 = scalar_lea.vmem %s29_s19, 16384  ;;  %p965_p4 = scmp.lt.s32.totalorder %s29_s19, %s29_s19 }
   0xa   :  { %p961_p3 = scmp.ne.s32.totalorder %s29_s19, %s960_s27  ;;  %p966_p5 = scmp.lt.s32.totalorder %s960_s27, %s960_s27 }
   0xc   :  { %p967_p6 = por %p966_p5, %p965_p4 }
   0xe   :  { %p968_p7 = pnand %p967_p6, %p961_p3 }
  0x10   :  { %971 = shalt.err (!%p968_p7)
}
  0x11   :  { %s1045_s28 = smov 128   ;;  %s1046_s29 = smov 8  }
  0x12   :  { %34 = dma.hbm_to_vmem [thread:$0]  %s1144_s1, 16384, %s29_s19, [#allocation6], %s1045_s28, %s1045_s28, %s1046_s29  }
  0x13   :  { %s1047_s7 = smov [#allocation2]   ;;  %s1048_s9 = smov [#allocation7]  }
  0x14   :  { %s19_s8 = sshll.u32 %s1047_s7, 4  ;;  %s42_s10 = sshll.u32 %s1048_s9, 4  ;;  %s20_s8 = int_to_ptr.vmem [resolvable:$true] %s19_s8  ;;  %s43_s10 = int_to_ptr.vmem [resolvable:$true] %s42_s10 }
  0x15   :  { %s972_s13 = scalar_lea.hbm %s1143_s0, 1024 }
  0x16   :  { %p973_p8 = scmp.ne.s32.totalorder %s1143_s0, %s972_s13  ;;  %p976_p9 = scmp.lt.u32.totalorder %s972_s13, %s1143_s0 }
  0x18   :  { %p978_p10 = pnand %p976_p9, %p973_p8 }
  0x1a   :  { %981 = shalt.err (!%p978_p10)
}
  0x1b   :  { %s982_s1 = scalar_lea.vmem %s20_s8, 1024  ;;  %p987_p12 = scmp.lt.s32.totalorder %s20_s8, %s20_s8 }
  0x1c   :  { %p983_p11 = scmp.ne.s32.totalorder %s20_s8, %s982_s1  ;;  %p988_p13 = scmp.lt.s32.totalorder %s982_s1, %s982_s1 }
  0x1e   :  { %p989_p0 = por %p988_p13, %p987_p12 }
  0x20   :  { %p990_p1 = pnand %p989_p0, %p983_p11 }
  0x22   :  { %993 = shalt.err (!%p990_p1)
}
  0x23   :  { %22 = dma.hbm_to_vmem [thread:$0]  %s1143_s0, 1024, %s20_s8, [#allocation3]  }
  0x24   :  { %s994_s22 = scalar_lea.hbm %s1146_s3, 2048 }
  0x25   :  { %p995_p2 = scmp.ne.s32.totalorder %s1146_s3, %s994_s22  ;;  %p998_p3 = scmp.lt.u32.totalorder %s994_s22, %s1146_s3 }
  0x27   :  { %p1000_p4 = pnand %p998_p3, %p995_p2 }
  0x29   :  { %1003 = shalt.err (!%p1000_p4)
}
  0x2a   :  { %s1004_s27 = scalar_lea.vmem %s43_s10, 2048  ;;  %p1009_p6 = scmp.lt.s32.totalorder %s43_s10, %s43_s10 }
  0x2b   :  { %p1005_p5 = scmp.ne.s32.totalorder %s43_s10, %s1004_s27  ;;  %p1010_p7 = scmp.lt.s32.totalorder %s1004_s27, %s1004_s27 }
  0x2d   :  { %p1011_p8 = por %p1010_p7, %p1009_p6 }
  0x2f   :  { %p1012_p9 = pnand %p1011_p8, %p1005_p5 }
  0x31   :  { %1015 = shalt.err (!%p1012_p9)
}
  0x32   :  { %48 = dma.hbm_to_vmem [thread:$0]  %s1146_s3, 2048, %s43_s10, [#allocation6], %s1045_s28, %s1045_s28, %s1046_s29  }
  0x33   :  { %1038 = dma.done.wait [#allocation3], 1024  }
  0x34   :  { %1039 = vsyncadd [#allocation3], 4294966272 }
  0x35   :  { %1040 = dma.done.wait [#allocation6], 18432  }
  0x36   :  { %1041 = vsyncadd [#allocation6], 4294948864  ;;  %v84_v0 = vld [vmem:[#allocation5 + $0x80] sm:$0xff]  ;;  %v85_v1 = vld [vmem:[#allocation5 + $0x88] sm:$0xff]  ;;  %vm1050_vm0 = vmmov 0  }
  0x37   :  { %v68_v2 = vld [vmem:[#allocation5] sm:$0xff]  ;;  %v789_v3 = vpack.c.bf16 %v85_v1, %v84_v0  ;;  %v69_v4 = vld [vmem:[#allocation5 + $0x8] sm:$0xff]  ;;  %v86_v11 = vld [vmem:[#allocation5 + $0x90] sm:$0xff] }
  0x38   :  { %v116_v5 = vld [vmem:[#allocation5 + $0x180] sm:$0xff]  ;;  %v117_v6 = vld [vmem:[#allocation5 + $0x188] sm:$0xff]  ;;  %v791_v7 = vpack.c.bf16 %v69_v4, %v68_v2  ;;  %v87_v13 = vld [vmem:[#allocation5 + $0x98] sm:$0xff] }
  0x39   :  { %v821_v8 = vpack.c.bf16 %v117_v6, %v116_v5  ;;  %v100_v9 = vld [vmem:[#allocation5 + $0x100] sm:$0xff]  ;;  %v101_v10 = vld [vmem:[#allocation5 + $0x108] sm:$0xff]  ;;  %790 = vmatprep.subr.bf16.mxu0 %v789_v3  ;;  %v70_v14 = vld [vmem:[#allocation5 + $0x10] sm:$0xff]  ;;  %v793_v16 = vpack.c.bf16 %v87_v13, %v86_v11 }
  0x3a   :  { %v823_v12 = vpack.c.bf16 %v101_v10, %v100_v9  ;;  %v71_v15 = vld [vmem:[#allocation5 + $0x18] sm:$0xff]  ;;  %792 = vmatpush3.bf16.msra.mxu0 %v791_v7  ;;  %v118_v18 = vld [vmem:[#allocation5 + $0x190] sm:$0xff]  ;;  %v88_v23 = vld [vmem:[#allocation5 + $0xa0] sm:$0xff] }
  0x3b   :  { %822 = vmatprep.subr.bf16.mxu1 %v821_v8  ;;  %v795_v17 = vpack.c.bf16 %v71_v15, %v70_v14  ;;  %v119_v19 = vld [vmem:[#allocation5 + $0x198] sm:$0xff]  ;;  %v102_v20 = vld [vmem:[#allocation5 + $0x110] sm:$0xff]  ;;  %v89_v24 = vld [vmem:[#allocation5 + $0xa8] sm:$0xff]  ;;  %794 = vmatprep.subr.bf16.mxu0 %v793_v16 }
  0x3c   :  { %824 = vmatpush3.bf16.msra.mxu1 %v823_v12  ;;  %v825_v21 = vpack.c.bf16 %v119_v19, %v118_v18  ;;  %v103_v22 = vld [vmem:[#allocation5 + $0x118] sm:$0xff]  ;;  %v797_v26 = vpack.c.bf16 %v89_v24, %v88_v23  ;;  %v72_v27 = vld [vmem:[#allocation5 + $0x20] sm:$0xff]  ;;  %v73_v28 = vld [vmem:[#allocation5 + $0x28] sm:$0xff] }
  0x3d   :  { %v827_v25 = vpack.c.bf16 %v103_v22, %v102_v20  ;;  %v120_v29 = vld [vmem:[#allocation5 + $0x1a0] sm:$0xff]  ;;  %v121_v30 = vld [vmem:[#allocation5 + $0x1a8] sm:$0xff]  ;;  %v799_v33 = vpack.c.bf16 %v73_v28, %v72_v27  ;;  %v90_v35 = vld [vmem:[#allocation5 + $0xb0] sm:$0xff] }
  0x3e   :  { %826 = vmatprep.subr.bf16.mxu1 %v825_v21  ;;  %v104_v31 = vld [vmem:[#allocation5 + $0x120] sm:$0xff]  ;;  %v105_v32 = vld [vmem:[#allocation5 + $0x128] sm:$0xff]  ;;  %796 = vmatpush3.bf16.msra.mxu0 %v795_v17  ;;  %v829_v34 = vpack.c.bf16 %v121_v30, %v120_v29  ;;  %v91_v36 = vld [vmem:[#allocation5 + $0xb8] sm:$0xff] }
  0x3f   :  { %v74_v37 = vld [vmem:[#allocation5 + $0x30] sm:$0xff]  ;;  %798 = vmatprep.subr.bf16.mxu0 %v797_v26  ;;  %v831_v38 = vpack.c.bf16 %v105_v32, %v104_v31  ;;  %v801_v39 = vpack.c.bf16 %v91_v36, %v90_v35  ;;  %v75_v40 = vld [vmem:[#allocation5 + $0x38] sm:$0xff]  ;;  %v92_v46 = vld [vmem:[#allocation5 + $0xc0] sm:$0xff] }
  0x40   :  { %828 = vmatpush3.bf16.msra.mxu1 %v827_v25  ;;  %v122_v41 = vld [vmem:[#allocation5 + $0x1b0] sm:$0xff]  ;;  %v123_v42 = vld [vmem:[#allocation5 + $0x1b8] sm:$0xff]  ;;  %v93_v47 = vld [vmem:[#allocation5 + $0xc8] sm:$0xff]  ;;  %v803_v48 = vpack.c.bf16 %v75_v40, %v74_v37 }
  0x41   :  { %830 = vmatprep.subr.bf16.mxu1 %v829_v34  ;;  %v833_v43 = vpack.c.bf16 %v123_v42, %v122_v41  ;;  %v106_v44 = vld [vmem:[#allocation5 + $0x130] sm:$0xff]  ;;  %v107_v45 = vld [vmem:[#allocation5 + $0x138] sm:$0xff]  ;;  %v124_v49 = vld [vmem:[#allocation5 + $0x1c0] sm:$0xff]  ;;  %v805_v52 = vpack.c.bf16 %v93_v47, %v92_v46 }
  0x42   :  { %800 = vmatpush3.bf16.msra.mxu0 %v799_v33  ;;  %v125_v50 = vld [vmem:[#allocation5 + $0x1c8] sm:$0xff]  ;;  %v835_v51 = vpack.c.bf16 %v107_v45, %v106_v44  ;;  %v76_v53 = vld [vmem:[#allocation5 + $0x40] sm:$0xff]  ;;  %v94_v58 = vld [vmem:[#allocation5 + $0xd0] sm:$0xff] }
  0x43   :  { %802 = vmatprep.subr.bf16.mxu0 %v801_v39  ;;  %v77_v54 = vld [vmem:[#allocation5 + $0x48] sm:$0xff]  ;;  %v108_v55 = vld [vmem:[#allocation5 + $0x140] sm:$0xff]  ;;  %v837_v56 = vpack.c.bf16 %v125_v50, %v124_v49  ;;  %v95_v59 = vld [vmem:[#allocation5 + $0xd8] sm:$0xff] }
  0x44   :  { %832 = vmatpush3.bf16.msra.mxu1 %v831_v38  ;;  %v109_v57 = vld [vmem:[#allocation5 + $0x148] sm:$0xff]  ;;  %v126_v60 = vld [vmem:[#allocation5 + $0x1d0] sm:$0xff]  ;;  %v127_v61 = vld [vmem:[#allocation5 + $0x1d8] sm:$0xff]  ;;  %v807_v62 = vpack.c.bf16 %v77_v54, %v76_v53  ;;  %v809_v0 = vpack.c.bf16 %v95_v59, %v94_v58 }
  0x45   :  { %834 = vmatprep.subr.bf16.mxu1 %v833_v43  ;;  %v839_v63 = vpack.c.bf16 %v109_v57, %v108_v55  ;;  %v78_v1 = vld [vmem:[#allocation5 + $0x50] sm:$0xff]  ;;  %v79_v2 = vld [vmem:[#allocation5 + $0x58] sm:$0xff]  ;;  %v841_v4 = vpack.c.bf16 %v127_v61, %v126_v60  ;;  %v96_v6 = vld [vmem:[#allocation5 + $0xe0] sm:$0xff] }
  0x46   :  { %804 = vmatpush3.bf16.msra.mxu0 %v803_v48  ;;  %v110_v3 = vld [vmem:[#allocation5 + $0x150] sm:$0xff]  ;;  %v111_v5 = vld [vmem:[#allocation5 + $0x158] sm:$0xff]  ;;  %v97_v7 = vld [vmem:[#allocation5 + $0xe8] sm:$0xff]  ;;  %v811_v10 = vpack.c.bf16 %v79_v2, %v78_v1 }
  0x47   :  { %806 = vmatprep.subr.bf16.mxu0 %v805_v52  ;;  %v128_v8 = vld [vmem:[#allocation5 + $0x1e0] sm:$0xff]  ;;  %v129_v9 = vld [vmem:[#allocation5 + $0x1e8] sm:$0xff]  ;;  %v843_v13 = vpack.c.bf16 %v111_v5, %v110_v3  ;;  %v813_v14 = vpack.c.bf16 %v97_v7, %v96_v6  ;;  %v98_v19 = vld [vmem:[#allocation5 + $0xf0] sm:$0xff] }
  0x48   :  { %836 = vmatpush3.bf16.msra.mxu1 %v835_v51  ;;  %v80_v11 = vld [vmem:[#allocation5 + $0x60] sm:$0xff]  ;;  %v81_v12 = vld [vmem:[#allocation5 + $0x68] sm:$0xff]  ;;  %v845_v18 = vpack.c.bf16 %v129_v9, %v128_v8  ;;  %v99_v20 = vld [vmem:[#allocation5 + $0xf8] sm:$0xff] }
  0x49   :  { %838 = vmatprep.subr.bf16.mxu1 %v837_v56  ;;  %v112_v15 = vld [vmem:[#allocation5 + $0x160] sm:$0xff]  ;;  %v113_v16 = vld [vmem:[#allocation5 + $0x168] sm:$0xff]  ;;  %v63_v21 = vld [vmem:[#allocation2 + $0x18] sm:$0xff]  ;;  %v815_v24 = vpack.c.bf16 %v81_v12, %v80_v11  ;;  %v817_v26 = vpack.c.bf16 %v99_v20, %v98_v19 }
  0x4a   :  { %808 = vmatpush3.bf16.msra.mxu0 %v807_v62  ;;  %v61_v17 = vld [vmem:[#allocation2 + $0x8] sm:$0xff]  ;;  %v130_v22 = vld [vmem:[#allocation5 + $0x1f0] sm:$0xff]  ;;  %v131_v23 = vld [vmem:[#allocation5 + $0x1f8] sm:$0xff]  ;;  %337 = vmatprep.mubr.f32.mxu1 %v63_v21  ;;  %v847_v25 = vpack.c.bf16 %v113_v16, %v112_v15 }
  0x4b   :  { %810 = vmatprep.subr.bf16.mxu0 %v809_v0  ;;  %267 = vmatprep.mubr.f32.mxu0 %v61_v17  ;;  %v82_v27 = vld [vmem:[#allocation5 + $0x70] sm:$0xff]  ;;  %v83_v28 = vld [vmem:[#allocation5 + $0x78] sm:$0xff]  ;;  %v849_v30 = vpack.c.bf16 %v131_v23, %v130_v22  ;;  %v148_v32 = vld [vmem:[#allocation5 + $0x280] sm:$0xff] }
  0x4c   :  { %840 = vmatpush3.bf16.msra.mxu1 %v839_v63  ;;  %v114_v29 = vld [vmem:[#allocation5 + $0x170] sm:$0xff]  ;;  %v115_v31 = vld [vmem:[#allocation5 + $0x178] sm:$0xff]  ;;  %v149_v33 = vld [vmem:[#allocation5 + $0x288] sm:$0xff]  ;;  %v819_v36 = vpack.c.bf16 %v83_v28, %v82_v27 }
  0x4d   :  { %842 = vmatprep.subr.bf16.mxu1 %v841_v4  ;;  %v180_v34 = vld [vmem:[#allocation5 + $0x380] sm:$0xff]  ;;  %v181_v35 = vld [vmem:[#allocation5 + $0x388] sm:$0xff]  ;;  %v851_v37 = vpack.c.bf16 %v115_v31, %v114_v29  ;;  %v853_v38 = vpack.c.bf16 %v149_v33, %v148_v32  ;;  %v150_v44 = vld [vmem:[#allocation5 + $0x290] sm:$0xff] }
  0x4e   :  { %812 = vmatpush3.bf16.msra.mxu0 %v811_v10  ;;  %v132_v39 = vld [vmem:[#allocation5 + $0x200] sm:$0xff]  ;;  %v133_v40 = vld [vmem:[#allocation5 + $0x208] sm:$0xff]  ;;  %v885_v42 = vpack.c.bf16 %v181_v35, %v180_v34  ;;  %v151_v45 = vld [vmem:[#allocation5 + $0x298] sm:$0xff] }
  0x4f   :  { %814 = vmatprep.subr.bf16.mxu0 %v813_v14  ;;  %v164_v41 = vld [vmem:[#allocation5 + $0x300] sm:$0xff]  ;;  %v165_v43 = vld [vmem:[#allocation5 + $0x308] sm:$0xff]  ;;  %v182_v46 = vld [vmem:[#allocation5 + $0x390] sm:$0xff]  ;;  %v855_v49 = vpack.c.bf16 %v133_v40, %v132_v39  ;;  %v857_v52 = vpack.c.bf16 %v151_v45, %v150_v44 }
  0x50   :  { %844 = vmatpush3.bf16.msra.mxu1 %v843_v13  ;;  %v183_v47 = vld [vmem:[#allocation5 + $0x398] sm:$0xff]  ;;  %v60_v48 = vld [vmem:[#allocation2] sm:$0xff]  ;;  %v62_v50 = vld [vmem:[#allocation2 + $0x10] sm:$0xff]  ;;  %v887_v51 = vpack.c.bf16 %v165_v43, %v164_v41 }
  0x51   :  { %846 = vmatprep.subr.bf16.mxu1 %v845_v18  ;;  %v134_v53 = vld [vmem:[#allocation5 + $0x210] sm:$0xff]  ;;  %v135_v54 = vld [vmem:[#allocation5 + $0x218] sm:$0xff]  ;;  %v889_v56 = vpack.c.bf16 %v183_v47, %v182_v46  ;;  %v152_v58 = vld [vmem:[#allocation5 + $0x2a0] sm:$0xff] }
  0x52   :  { %816 = vmatpush3.bf16.msra.mxu0 %v815_v24  ;;  %v166_v55 = vld [vmem:[#allocation5 + $0x310] sm:$0xff]  ;;  %v167_v57 = vld [vmem:[#allocation5 + $0x318] sm:$0xff]  ;;  %v153_v59 = vld [vmem:[#allocation5 + $0x2a8] sm:$0xff]  ;;  %v859_v62 = vpack.c.bf16 %v135_v54, %v134_v53 }
  0x53   :  { %818 = vmatprep.subr.bf16.mxu0 %v817_v26  ;;  %v184_v60 = vld [vmem:[#allocation5 + $0x3a0] sm:$0xff]  ;;  %v185_v61 = vld [vmem:[#allocation5 + $0x3a8] sm:$0xff]  ;;  %v891_v63 = vpack.c.bf16 %v167_v57, %v166_v55  ;;  %v861_v0 = vpack.c.bf16 %v153_v59, %v152_v58  ;;  %v154_v6 = vld [vmem:[#allocation5 + $0x2b0] sm:$0xff] }
  0x54   :  { %848 = vmatpush3.bf16.msra.mxu1 %v847_v25  ;;  %v136_v1 = vld [vmem:[#allocation5 + $0x220] sm:$0xff]  ;;  %v137_v2 = vld [vmem:[#allocation5 + $0x228] sm:$0xff]  ;;  %v893_v4 = vpack.c.bf16 %v185_v61, %v184_v60  ;;  %v155_v7 = vld [vmem:[#allocation5 + $0x2b8] sm:$0xff] }
  0x55   :  { %850 = vmatprep.subr.bf16.mxu1 %v849_v30  ;;  %v168_v3 = vld [vmem:[#allocation5 + $0x320] sm:$0xff]  ;;  %v169_v5 = vld [vmem:[#allocation5 + $0x328] sm:$0xff]  ;;  %v186_v8 = vld [vmem:[#allocation5 + $0x3b0] sm:$0xff]  ;;  %v863_v10 = vpack.c.bf16 %v137_v2, %v136_v1  ;;  %v865_v12 = vpack.c.bf16 %v155_v7, %v154_v6 }
  0x56   :  { %820 = vmatpush3.bf16.msra.mxu0 %v819_v36  ;;  %v187_v9 = vld [vmem:[#allocation5 + $0x3b8] sm:$0xff]  ;;  %v895_v11 = vpack.c.bf16 %v169_v5, %v168_v3  ;;  %v138_v13 = vld [vmem:[#allocation5 + $0x230] sm:$0xff]  ;;  %v156_v18 = vld [vmem:[#allocation5 + $0x2c0] sm:$0xff] }
  0x57   :  { %854 = vmatprep.subr.bf16.mxu0 %v853_v38  ;;  %v139_v14 = vld [vmem:[#allocation5 + $0x238] sm:$0xff]  ;;  %v170_v15 = vld [vmem:[#allocation5 + $0x330] sm:$0xff]  ;;  %v897_v16 = vpack.c.bf16 %v187_v9, %v186_v8  ;;  %v157_v19 = vld [vmem:[#allocation5 + $0x2c8] sm:$0xff] }
  0x58   :  { %852 = vmatpush3.bf16.msra.mxu1 %v851_v37  ;;  %v171_v17 = vld [vmem:[#allocation5 + $0x338] sm:$0xff]  ;;  %v188_v20 = vld [vmem:[#allocation5 + $0x3c0] sm:$0xff]  ;;  %v189_v21 = vld [vmem:[#allocation5 + $0x3c8] sm:$0xff]  ;;  %v867_v22 = vpack.c.bf16 %v139_v14, %v138_v13  ;;  %v869_v26 = vpack.c.bf16 %v157_v19, %v156_v18 }
  0x59   :  { %886 = vmatprep.subr.bf16.mxu1 %v885_v42  ;;  %268 = vmatmul.mubr.f32.vlgmr.msra.gmra.mrb[0].mxu0 %v60_v48  ;;  %v65_v23 = vld [vmem:[#allocation2 + $0x28] sm:$0xff]  ;;  %v67_v24 = vld [vmem:[#allocation2 + $0x38] sm:$0xff]  ;;  %v899_v25 = vpack.c.bf16 %v171_v17, %v170_v15  ;;  %v140_v27 = vld [vmem:[#allocation5 + $0x240] sm:$0xff]  ;;  %v901_v30 = vpack.c.bf16 %v189_v21, %v188_v20 }
  0x5a   :  { %856 = vmatpush3.bf16.msra.mxu0 %v855_v49  ;;  %v141_v28 = vld [vmem:[#allocation5 + $0x248] sm:$0xff]  ;;  %v172_v29 = vld [vmem:[#allocation5 + $0x340] sm:$0xff]  ;;  %v158_v32 = vld [vmem:[#allocation5 + $0x2d0] sm:$0xff]  ;;  %407 = vmatprep.mubr.f32.mxu0 %v65_v23 }
  0x5b   :  { %338 = vmatmul.mubr.f32.vlgmr.msra.gmra.mrb[0].mxu1 %v62_v50  ;;  %858 = vmatprep.subr.bf16.mxu0 %v857_v52  ;;  %v173_v31 = vld [vmem:[#allocation5 + $0x348] sm:$0xff]  ;;  %v159_v33 = vld [vmem:[#allocation5 + $0x2d8] sm:$0xff]  ;;  %v190_v34 = vld [vmem:[#allocation5 + $0x3d0] sm:$0xff]  ;;  %v871_v36 = vpack.c.bf16 %v141_v28, %v140_v27 }
  0x5c   :  { %888 = vmatpush3.bf16.msra.mxu1 %v887_v51  ;;  %v191_v35 = vld [vmem:[#allocation5 + $0x3d8] sm:$0xff]  ;;  %477 = vmatprep.mubr.f32.mxu1 %v67_v24  ;;  %v903_v37 = vpack.c.bf16 %v173_v31, %v172_v29  ;;  %v873_v38 = vpack.c.bf16 %v159_v33, %v158_v32  ;;  %v142_v39 = vld [vmem:[#allocation5 + $0x250] sm:$0xff]  ;;  %v160_v44 = vld [vmem:[#allocation5 + $0x2e0] sm:$0xff]  ;;  %v1051_v33 = vmov 0.0  }
  0x5d   :  { %890 = vmatprep.subr.bf16.mxu1 %v889_v56  ;;  %v143_v40 = vld [vmem:[#allocation5 + $0x258] sm:$0xff]  ;;  %v174_v41 = vld [vmem:[#allocation5 + $0x350] sm:$0xff]  ;;  %v905_v42 = vpack.c.bf16 %v191_v35, %v190_v34  ;;  %v161_v45 = vld [vmem:[#allocation5 + $0x2e8] sm:$0xff] }
  0x5e   :  { %860 = vmatpush3.bf16.msra.mxu0 %v859_v62  ;;  %v175_v43 = vld [vmem:[#allocation5 + $0x358] sm:$0xff]  ;;  %v192_v46 = vld [vmem:[#allocation5 + $0x3e0] sm:$0xff]  ;;  %v193_v47 = vld [vmem:[#allocation5 + $0x3e8] sm:$0xff]  ;;  %v875_v48 = vpack.c.bf16 %v143_v40, %v142_v39  ;;  %v877_v50 = vpack.c.bf16 %v161_v45, %v160_v44 }
  0x5f   :  { %862 = vmatprep.subr.bf16.mxu0 %v861_v0  ;;  %v907_v49 = vpack.c.bf16 %v175_v43, %v174_v41  ;;  %v144_v51 = vld [vmem:[#allocation5 + $0x260] sm:$0xff]  ;;  %v145_v52 = vld [vmem:[#allocation5 + $0x268] sm:$0xff]  ;;  %v909_v54 = vpack.c.bf16 %v193_v47, %v192_v46  ;;  %v162_v56 = vld [vmem:[#allocation5 + $0x2f0] sm:$0xff] }
  0x60   :  { %892 = vmatpush3.bf16.msra.mxu1 %v891_v63  ;;  %v176_v53 = vld [vmem:[#allocation5 + $0x360] sm:$0xff]  ;;  %v177_v55 = vld [vmem:[#allocation5 + $0x368] sm:$0xff]  ;;  %v163_v57 = vld [vmem:[#allocation5 + $0x2f8] sm:$0xff]  ;;  %v879_v60 = vpack.c.bf16 %v145_v52, %v144_v51 }
  0x61   :  { %894 = vmatprep.subr.bf16.mxu1 %v893_v4  ;;  %v194_v58 = vld [vmem:[#allocation5 + $0x3f0] sm:$0xff]  ;;  %v195_v59 = vld [vmem:[#allocation5 + $0x3f8] sm:$0xff]  ;;  %v911_v61 = vpack.c.bf16 %v177_v55, %v176_v53  ;;  %v881_v62 = vpack.c.bf16 %v163_v57, %v162_v56  ;;  %v64_v6 = vld [vmem:[#allocation2 + $0x20] sm:$0xff] }
  0x62   :  { %864 = vmatpush3.bf16.msra.mxu0 %v863_v10  ;;  %v146_v63 = vld [vmem:[#allocation5 + $0x270] sm:$0xff]  ;;  %v147_v0 = vld [vmem:[#allocation5 + $0x278] sm:$0xff]  ;;  %v913_v1 = vpack.c.bf16 %v195_v59, %v194_v58  ;;  %v484_v8 = vld [vmem:[#allocation7] sm:$0xff] }
  0x63   :  { %866 = vmatprep.subr.bf16.mxu0 %v865_v12  ;;  %v178_v2 = vld [vmem:[#allocation5 + $0x370] sm:$0xff]  ;;  %v179_v3 = vld [vmem:[#allocation5 + $0x378] sm:$0xff]  ;;  %v883_v4 = vpack.c.bf16 %v147_v0, %v146_v63  ;;  %v485_v9 = vld [vmem:[#allocation7 + $0x8] sm:$0xff] }
  0x64   :  { %896 = vmatpush3.bf16.msra.mxu1 %v895_v11  ;;  %v915_v5 = vpack.c.bf16 %v179_v3, %v178_v2  ;;  %v66_v7 = vld [vmem:[#allocation2 + $0x30] sm:$0xff]  ;;  %v1049_v11 = vmov 0.0|0.0   ;;  %v918_v12 = vpack.c.bf16 %v485_v9, %v484_v8  ;;  %v487_v13 = vld [vmem:[#allocation7 + $0x18] sm:$0xff]  ;;  %v488_v15 = vld [vmem:[#allocation7 + $0x20] sm:$0xff] }
  0x65   :  { %898 = vmatprep.subr.bf16.mxu1 %v897_v16  ;;  %v486_v10 = vld [vmem:[#allocation7 + $0x10] sm:$0xff]  ;;  %v489_v16 = vld [vmem:[#allocation7 + $0x28] sm:$0xff]  ;;  %v491_v19 = vld [vmem:[#allocation7 + $0x38] sm:$0xff] }
  0x66   :  { %868 = vmatpush3.bf16.msra.mxu0 %v867_v22  ;;  %v921_v14 = vpack.c.bf16 %v487_v13, %v486_v10  ;;  %v924_v17 = vpack.c.bf16 %v489_v16, %v488_v15  ;;  %v490_v18 = vld [vmem:[#allocation7 + $0x30] sm:$0xff]  ;;  %v492_v21 = vld [vmem:[#allocation7 + $0x40] sm:$0xff]  ;;  %v493_v22 = vld [vmem:[#allocation7 + $0x48] sm:$0xff] }
  0x67   :  { %870 = vmatprep.subr.bf16.mxu0 %v869_v26  ;;  %v927_v20 = vpack.c.bf16 %v491_v19, %v490_v18  ;;  %v930_v23 = vpack.c.bf16 %v493_v22, %v492_v21  ;;  %v494_v24 = vld [vmem:[#allocation7 + $0x50] sm:$0xff]  ;;  %v496_v27 = vld [vmem:[#allocation7 + $0x60] sm:$0xff]  ;;  %v497_v28 = vld [vmem:[#allocation7 + $0x68] sm:$0xff] }
  0x68   :  { %900 = vmatpush3.bf16.msra.mxu1 %v899_v25  ;;  %v495_v25 = vld [vmem:[#allocation7 + $0x58] sm:$0xff]  ;;  %v936_v29 = vpack.c.bf16 %v497_v28, %v496_v27  ;;  %v595_v35 = vld [vmem:[%s1145_s2] ss:$0 sm:$0xff]  ;;  %s1052_s2 = smov [#allocation8]  }
  0x69   :  { %902 = vmatprep.subr.bf16.mxu1 %v901_v30  ;;  %v933_v26 = vpack.c.bf16 %v495_v25, %v494_v24  ;;  %v498_v30 = vld [vmem:[#allocation7 + $0x70] sm:$0xff]  ;;  %v499_v31 = vld [vmem:[#allocation7 + $0x78] sm:$0xff]  ;;  %v596_v52 = vld [vmem:[%s1147_s4] ss:$0 sm:$0xff]  ;;  %s585_s7 = sshll.u32 %s1052_s2, 4  ;;  %s586_s7 = int_to_ptr.vmem [resolvable:$true] %s585_s7 }
  0x6a   :  { %872 = vmatpush3.bf16.msra.mxu0 %v871_v36  ;;  %v939_v32 = vpack.c.bf16 %v499_v31, %v498_v30  ;;  %s1016_s8 = scalar_lea.vmem %s586_s7, 128  ;;  %p1021_p11 = scmp.lt.s32.totalorder %s586_s7, %s586_s7 }
  0x6b   :  { %874 = vmatprep.subr.bf16.mxu0 %v873_v38  ;;  %p1017_p10 = scmp.ne.s32.totalorder %s586_s7, %s1016_s8  ;;  %p1022_p12 = scmp.lt.s32.totalorder %s1016_s8, %s1016_s8 }
  0x6c   :  { %904 = vmatpush3.bf16.msra.mxu1 %v903_v37 }
  0x6d   :  { %906 = vmatprep.subr.bf16.mxu1 %v905_v42  ;;  %p1023_p13 = por %p1022_p12, %p1021_p11 }
  0x6e   :  { %876 = vmatpush3.bf16.msra.mxu0 %v875_v48 }
  0x6f   :  { %878 = vmatprep.subr.bf16.mxu0 %v877_v50  ;;  %p1024_p0 = pnand %p1023_p13, %p1017_p10 }
  0x70   :  { %908 = vmatpush3.bf16.msra.mxu1 %v907_v49 }
  0x71   :  { %910 = vmatprep.subr.bf16.mxu1 %v909_v54 }
  0x72   :  { %880 = vmatpush3.bf16.msra.mxu0 %v879_v60 }
  0x73   :  { %882 = vmatprep.subr.bf16.mxu0 %v881_v62 }
  0x74   :  { %912 = vmatpush3.bf16.msra.mxu1 %v911_v61 }
  0x75   :  { %914 = vmatprep.subr.bf16.mxu1 %v913_v1 }
  0x76   :  { %884 = vmatpush3.bf16.msra.mxu0 %v883_v4 }
  0x77   :  { %917 = vmatprep.subr.bf16.mxu0 %v1049_v11 }
  0x78   :  { %916 = vmatpush3.bf16.msra.mxu1 %v915_v5 }
  0x79   :  { %408 = vmatmul.mubr.f32.vlgmr.msra.gmra.mrb[2].mxu0 %v64_v6 }
  0x7a   :  { %919 = vmatpush3.bf16.msra.mxu0 %v918_v12  ;;  %786 = vmatprep.mubr.msk.f32.mxu0 %vm1050_vm0, %v1051_v33 }
  0x7b   :  { %478 = vmatmul.mubr.f32.vlgmr.msra.gmra.mrb[2].mxu1 %v66_v7  ;;  %920 = vmatprep.subr.bf16.mxu0 %v1049_v11 }
  0x7e   :  { %922 = vmatpush3.bf16.msra.mxu0 %v921_v14 }
  0x7f   :  { %923 = vmatprep.subr.bf16.mxu0 %v1049_v11 }
  0x82   :  { %925 = vmatpush3.bf16.msra.mxu0 %v924_v17 }
  0x83   :  { %926 = vmatprep.subr.bf16.mxu0 %v1049_v11 }
  0x86   :  { %928 = vmatpush3.bf16.msra.mxu0 %v927_v20 }
  0x87   :  { %929 = vmatprep.subr.bf16.mxu0 %v1049_v11 }
  0x8a   :  { %931 = vmatpush3.bf16.msra.mxu0 %v930_v23 }
  0x8b   :  { %932 = vmatprep.subr.bf16.mxu0 %v1049_v11 }
  0x8e   :  { %934 = vmatpush3.bf16.msra.mxu0 %v933_v26 }
  0x8f   :  { %935 = vmatprep.subr.bf16.mxu0 %v1049_v11 }
  0x92   :  { %937 = vmatpush3.bf16.msra.mxu0 %v936_v29 }
  0x93   :  { %938 = vmatprep.subr.bf16.mxu0 %v1049_v11 }
  0x96   :  { %940 = vmatpush3.bf16.msra.mxu0 %v939_v32 }
 0x12c   :  { %v629_v34 = vpop.f32.mrb[0].mxu0 }
 0x12d   :  { %v630_v36 = vpop.f32.mrb[1].mxu0 }
 0x12e   :  { %v664_v37 = vpop.f32.mrb[0].mxu1  ;;  %v631_v38 = vadd.f32 %v630_v36, %v629_v34 }
 0x12f   :  { %v665_v39 = vpop.f32.mrb[1].mxu1 }
 0x130   :  { %v666_v40 = vadd.f32 %v665_v39, %v664_v37  ;;  %v270_v41 = vadd.f32 %v631_v38, %v595_v35 }
 0x132   :  { %v340_v42 = vadd.f32 %v666_v40, %v270_v41 }
 0x14c   :  { %v699_v43 = vpop.f32.mrb[2].mxu0 }
 0x14d   :  { %v700_v44 = vpop.f32.mrb[3].mxu0 }
 0x14e   :  { %v734_v45 = vpop.f32.mrb[2].mxu1  ;;  %v701_v46 = vadd.f32 %v700_v44, %v699_v43 }
 0x14f   :  { %v735_v47 = vpop.f32.mrb[3].mxu1 }
 0x150   :  { %v736_v48 = vadd.f32 %v735_v47, %v734_v45  ;;  %v410_v49 = vadd.f32 %v701_v46, %v340_v42 }
 0x152   :  { %v480_v50 = vadd.f32 %v736_v48, %v410_v49 }
 0x154   :  { %v483_v51 = vmax.f32 %v480_v50, 0.0 }
 0x156   :  { %787 = vmatmul.mubr.f32.vlgmr.msra.gmra.mrb[4].mxu0 %v483_v51 }
 0x229   :  { %v573_v53 = vpop.f32.mrb[4].mxu0 }
 0x22a   :  { %v574_v54 = vadd.f32 %v596_v52, %v573_v53  ;;  %v788_v55 = vpop.f32.mrb[5].mxu0 }
 0x22c   :  { %v577_v56 = vmax.f32 %v574_v54, 0.0 }
 0x22e   :  { %578 = vst [vmem:[#allocation8] sm:$0xff] %v577_v56 }
 0x22f   :  { %1027 = shalt.err (!%p1024_p0)
}
 0x230   :  { %s1028_s11 = scalar_lea.hbm %s1148_s5, 128 }
 0x231   :  { %p1029_p1 = scmp.ne.s32.totalorder %s1148_s5, %s1028_s11  ;;  %p1032_p2 = scmp.lt.u32.totalorder %s1028_s11, %s1148_s5 }
 0x233   :  { %p1034_p3 = pnand %p1032_p2, %p1029_p1 }
 0x235   :  { %1037 = shalt.err (!%p1034_p3)
}
 0x236   :  { %588 = dma.vmem_to_hbm [thread:$0]  %s586_s7, 128, %s1148_s5, [#allocation4]  }
 0x237   :  { %1042 = dma.done.wait [#allocation4], 128  }
 0x238   :  { %1043 = vsyncadd [#allocation4], 4294967168 }
 0x239   :  { %592 = vsyncpa [#allocation3], 1 }
 0x23a   :  { %593 = vsyncpa [#allocation6], 1 }
 0x23b   :  { %594 = vsyncpa [#allocation4], 1 }

</bundles_post_ra>
